<compile_context>
chip_gen: v6e
topology: v6e:2x2x1
jax: 0.10.0
libtpu: 0.0.40
codegen_flags: <defaults>
</compile_context>

<pallas_src>
import math
import functools

import jax
import jax.numpy as jnp
from jax.experimental import pallas as pl
from jax.experimental.pallas import tpu as pltpu


# -----------------------------------------------------------------------------
# Stage 1: fused Q/K/V projection (stacked per-head Linears as one ExE matmul
# per mode).  Runs once per (batch, seq-tile) -- no per-q-tile K/V reprojection.
# -----------------------------------------------------------------------------
def _projection_kernel(q_ref, k_ref, v_ref,
                       wq_ref, bq_ref, wk_ref, bk_ref, wv_ref, bv_ref,
                       qo_ref, ko_ref, vo_ref, *, scale):
    def project(x_ref, w_ref, b_ref):
        return jnp.dot(x_ref[0], w_ref[...],
                       preferred_element_type=jnp.float32) + b_ref[...]

    # 1/sqrt(head_dim) folded into Q once (not per-head on [S, S] scores).
    qo_ref[0] = (project(q_ref, wq_ref, bq_ref) * scale).astype(qo_ref.dtype)
    ko_ref[0] = project(k_ref, wk_ref, bk_ref).astype(ko_ref.dtype)
    vo_ref[0] = project(v_ref, wv_ref, bv_ref).astype(vo_ref.dtype)


# -----------------------------------------------------------------------------
# Stage 2: flash attention (online softmax over kv tiles) + fused output proj.
# Grid = (B, n_q_tiles, num_heads, n_kv_tiles);   heads & kv are reductions.
# -----------------------------------------------------------------------------
def _flash_attention_kernel(q_ref, kt_ref, v_ref, wo_ref, bo_ref, o_ref,
                            m_ref, l_ref, acc_ref, oacc_ref):
    h = pl.program_id(2)
    ki = pl.program_id(3)
    n_heads = pl.num_programs(2)
    n_kv = pl.num_programs(3)

    @pl.when((h == 0) & (ki == 0))
    def _init_output_accumulator():
        oacc_ref[...] = jnp.zeros_like(oacc_ref)

    @pl.when(ki == 0)
    def _init_head_state():
        m_ref[...] = jnp.full_like(m_ref, -jnp.inf)
        l_ref[...] = jnp.zeros_like(l_ref)
        acc_ref[...] = jnp.zeros_like(acc_ref)

    q = q_ref[0, 0]        # [Tq, hd] bf16 (pre-scaled by 1/sqrt(hd))
    kt = kt_ref[0, 0]      # [hd, Tk] bf16 (pre-transposed -> plain MXU matmul)
    v = v_ref[0, 0]        # [Tk, hd] bf16

    s = jnp.dot(q, kt, preferred_element_type=jnp.float32)          # [Tq, Tk] f32

    m_prev = m_ref[...]
    m_new = jnp.maximum(m_prev, jnp.max(s, axis=-1, keepdims=True))
    alpha = jnp.exp(m_prev - m_new)                                  # f32
    p = jnp.exp(s - m_new)                                           # f32
    l_ref[...] = alpha * l_ref[...] + jnp.sum(p, axis=-1, keepdims=True)
    acc_ref[...] = alpha * acc_ref[...] + jnp.dot(
        p.astype(jnp.bfloat16), v, preferred_element_type=jnp.float32)
    m_ref[...] = m_new

    @pl.when(ki == n_kv - 1)
    def _finalize_head():
        # Exact normalization -- only runs once per head per q-tile (epilogue).
        rep = acc_ref[...] / l_ref[...]                              # [Tq, hd] f32
        # attention_dropout: identity (eval mode)
        # Fused output projection: rows of Wo belonging to head h.
        oacc_ref[...] += jnp.dot(rep.astype(jnp.bfloat16), wo_ref[0],
                                 preferred_element_type=jnp.float32)

    @pl.when((h == n_heads - 1) & (ki == n_kv - 1))
    def _store():
        # output_dropout: identity (eval mode)
        o_ref[0] = (oacc_ref[...] + bo_ref[...]).astype(o_ref.dtype)


# -----------------------------------------------------------------------------
# Tiling / VMEM helpers (generation-aware).
# -----------------------------------------------------------------------------
def _vmem_capacity_bytes():
    try:
        return int(pltpu.get_tpu_info().vmem_capacity_bytes)
    except Exception:
        return 64 * 1024 * 1024        # conservative default (v7x per-TensorCore)


def _pick_tile(seq_len, candidates):
    for t in candidates:
        if seq_len % t == 0:
            return t
    return seq_len                      # full extent is always a legal block


def _pick_q_tile(batch, seq_len, big_vmem):
    cands = (512, 256, 128) if big_vmem else (256, 128)
    tq = _pick_tile(seq_len, cands)
    # Guarantee >= 2 parallel grid points (megacore / v7x dual TC) when possible,
    # while keeping the sublane dim a multiple of 8.
    while (batch * (seq_len // tq) < 2 and tq > 8
           and (tq // 2) % 8 == 0 and seq_len % (tq // 2) == 0):
        tq //= 2
    return tq


# -----------------------------------------------------------------------------
# Wrapper
# -----------------------------------------------------------------------------
def _mha_impl(query, key, value, params, *, num_heads, single_buffer_consts):
    B, S, E = query.shape
    assert E % num_heads == 0
    hd = E // num_heads
    scale = 1.0 / math.sqrt(hd)

    vmem_cap = _vmem_capacity_bytes()
    big_vmem = vmem_cap >= 100 * 1024 * 1024
    w_copies = 1 if single_buffer_consts else 2

    def const_spec(block_shape, index_map):
        # Constant index map -> double buffering buys nothing; keep one resident
        # copy (matters most at large E on v7x's 64 MiB VMEM).
        if single_buffer_consts:
            return pl.BlockSpec(block_shape, index_map,
                                pipeline_mode=pl.Buffered(1))
        return pl.BlockSpec(block_shape, index_map)

    # bf16 matmul operands; biases and all accumulation / softmax stay f32.
    to_bf16 = lambda x: x.astype(jnp.bfloat16)
    q_b, k_b, v_b = to_bf16(query), to_bf16(key), to_bf16(value)
    wq, wk, wv = (to_bf16(params[n]) for n in ("wq", "wk", "wv"))
    bq, bk, bv, bo = (params[n].astype(jnp.float32)
                      for n in ("bq", "bk", "bv", "bo"))
    wo3 = to_bf16(params["wo"]).reshape(num_heads, hd, E)   # row block h -> head h

    # ---------------- Stage 1: projections ----------------
    ts = _pick_tile(S, (512, 256, 128) if big_vmem else (256, 128))
    n_s = S // ts

    x_spec = pl.BlockSpec((1, ts, E), lambda b, t: (b, t, 0))
    w_spec = const_spec((E, E), lambda b, t: (0, 0))
    b_spec = const_spec((1, E), lambda b, t: (0, 0))
    proj_out_spec = pl.BlockSpec((1, ts, E), lambda b, t: (b, t, 0))

    proj_vmem = (2 * 3 * ts * E * 2            # q/k/v input blocks (bf16, 2 bufs)
                 + w_copies * 3 * E * E * 2    # weights
                 + w_copies * 3 * E * 4        # biases
                 + 2 * 3 * ts * E * 2          # bf16 outputs (2 bufs)
                 + 3 * ts * E * 4)             # f32 matmul results before cast
    proj_limit = int(min(vmem_cap - (8 << 20), max(32 << 20, 2 * proj_vmem)))

    proj_cost = pl.CostEstimate(
        flops=6 * B * S * E * E,
        transcendentals=0,
        bytes_accessed=6 * B * S * E * 2 + 3 * E * E * 2 + 3 * E * 4)

    qh, kh, vh = pl.pallas_call(
        functools.partial(_projection_kernel, scale=scale),
        out_shape=(jax.ShapeDtypeStruct((B, S, E), jnp.bfloat16),) * 3,
        grid_spec=pltpu.PrefetchScalarGridSpec(
            num_scalar_prefetch=0,
            grid=(B, n_s),
            in_specs=[x_spec, x_spec, x_spec,
                      w_spec, b_spec, w_spec, b_spec, w_spec, b_spec],
            out_specs=[proj_out_spec, proj_out_spec, proj_out_spec],
        ),
        compiler_params=pltpu.CompilerParams(
            dimension_semantics=("parallel", "parallel"),
            vmem_limit_bytes=proj_limit),
        cost_estimate=proj_cost,
    )(q_b, k_b, v_b, wq, bq, wk, bk, wv, bv)

    # Wrapper-side layout plumbing (plain XLA): head-major views so every head
    # operand is a whole BlockSpec block, and K is pre-transposed exactly once.
    qh4 = qh.reshape(B, S, num_heads, hd).transpose(0, 2, 1, 3)   # [B, H, S, hd]
    kt4 = kh.reshape(B, S, num_heads, hd).transpose(0, 2, 3, 1)   # [B, H, hd, S]
    vh4 = vh.reshape(B, S, num_heads, hd).transpose(0, 2, 1, 3)   # [B, H, S, hd]

    # ---------------- Stage 2: flash attention + fused Wo ----------------
    tq = _pick_q_tile(B, S, big_vmem)
    tk = _pick_tile(S, (512, 256, 128) if big_vmem else (256, 128))
    n_q, n_kv = S // tq, S // tk

    q_spec = pl.BlockSpec((1, 1, tq, hd), lambda b, qi, h, ki: (b, h, qi, 0))
    kt_spec = pl.BlockSpec((1, 1, hd, tk), lambda b, qi, h, ki: (b, h, 0, ki))
    v_spec = pl.BlockSpec((1, 1, tk, hd), lambda b, qi, h, ki: (b, h, ki, 0))
    wo_spec = pl.BlockSpec((1, hd, E), lambda b, qi, h, ki: (h, 0, 0))
    bo_spec = const_spec((1, E), lambda b, qi, h, ki: (0, 0))
    o_spec = pl.BlockSpec((1, tq, E), lambda b, qi, h, ki: (b, qi, 0))

    attn_vmem = (2 * (tq * hd + hd * tk + tk * hd) * 2   # q / kT / v blocks (bf16, 2 bufs)
                 + 2 * hd * E * 2                        # per-head Wo block (pipelined)
                 + w_copies * E * 4                      # bo
                 + 2 * tq * E * 4                        # output block
                 + (2 * tq + tq * hd + tq * E) * 4       # m / l / head acc / Wo acc scratch
                 + 4 * tq * tk * 4)                      # scores / exp temporaries
    attn_limit = int(min(vmem_cap - (8 << 20), max(32 << 20, 2 * attn_vmem)))

    attn_cost = pl.CostEstimate(
        flops=4 * B * S * S * E + 2 * B * S * E * E,
        transcendentals=B * num_heads * S * S,
        bytes_accessed=(B * S * E * 2                  # q (bf16)
                        + 2 * n_q * B * S * E * 2      # k/v re-streamed per q tile
                        + n_q * B * E * E * 2          # Wo per (b, q-tile)
                        + E * 4
                        + B * S * E * 4))              # f32 output

    return pl.pallas_call(
        _flash_attention_kernel,
        out_shape=jax.ShapeDtypeStruct((B, S, E), jnp.float32),
        grid_spec=pltpu.PrefetchScalarGridSpec(
            num_scalar_prefetch=0,
            grid=(B, n_q, num_heads, n_kv),
            in_specs=[q_spec, kt_spec, v_spec, wo_spec, bo_spec],
            out_specs=o_spec,
            scratch_shapes=[
                pltpu.VMEM((tq, 1), jnp.float32),     # running max
                pltpu.VMEM((tq, 1), jnp.float32),     # running denominator
                pltpu.VMEM((tq, hd), jnp.float32),    # per-head accumulator
                pltpu.VMEM((tq, E), jnp.float32),     # fused output-proj accumulator
            ],
        ),
        compiler_params=pltpu.CompilerParams(
            dimension_semantics=("parallel", "parallel", "arbitrary", "arbitrary"),
            vmem_limit_bytes=attn_limit),
        cost_estimate=attn_cost,
    )(qh4, kt4, vh4, wo3, bo)


def multi_head_attention(query, key, value, params, *, num_heads):
    """query/key/value: [B, S, E] float32.  params: dict of stacked f32 weights."""
    try:
        return _mha_impl(query, key, value, params, num_heads=num_heads,
                         single_buffer_consts=True)
    except Exception:
        # Fallback for Pallas versions without BlockSpec(pipeline_mode=Buffered(1)):
        # identical kernels, default double-buffered constant operands.
        return _mha_impl(query, key, value, params, num_heads=num_heads,
                         single_buffer_consts=False)


# -----------------------------------------------------------------------------
# Parameters / reference
# -----------------------------------------------------------------------------
def init_params(key, embedding_dim, num_heads):
    """Deterministic synthetic parameters matching the module's shapes.

    Each mode has `num_heads` Linear(E, head_dim) layers; their (transposed)
    weights are stacked along the output axis into one [E, E] matrix so the
    concatenated-head projection is a single matmul.
    """
    head_dim = embedding_dim // num_heads
    keys = jax.random.split(key, 8)
    bound = 1.0 / math.sqrt(embedding_dim)    # PyTorch Linear default init bound

    def make_stacked(kw, kb):
        w = jax.random.uniform(kw, (num_heads, head_dim, embedding_dim),
                               minval=-bound, maxval=bound, dtype=jnp.float32)
        b = jax.random.uniform(kb, (num_heads, head_dim),
                               minval=-bound, maxval=bound, dtype=jnp.float32)
        w_stacked = jnp.concatenate([w[h].T for h in range(num_heads)], axis=1)
        b_stacked = b.reshape(1, embedding_dim)
        return w_stacked, b_stacked

    wq, bq = make_stacked(keys[0], keys[1])
    wk, bk = make_stacked(keys[2], keys[3])
    wv, bv = make_stacked(keys[4], keys[5])
    wo = jax.random.uniform(keys[6], (embedding_dim, embedding_dim),
                            minval=-bound, maxval=bound, dtype=jnp.float32)
    bo = jax.random.uniform(keys[7], (1, embedding_dim),
                            minval=-bound, maxval=bound, dtype=jnp.float32)
    return {"wq": wq, "bq": bq, "wk": wk, "bk": bk,
            "wv": wv, "bv": bv, "wo": wo, "bo": bo}


def reference_mha(query, key, value, params, *, num_heads):
    """Plain-JAX f32 reference mirroring the PyTorch forward (eval mode)."""
    E = query.shape[-1]
    hd = E // num_heads
    qh = query @ params["wq"] + params["bq"]
    kh = key @ params["wk"] + params["bk"]
    vh = value @ params["wv"] + params["bv"]
    heads = []
    for h in range(num_heads):
        qs, ks, vs = (t[..., h * hd:(h + 1) * hd] for t in (qh, kh, vh))
        scores = qs @ jnp.swapaxes(ks, -1, -2) / math.sqrt(hd)
        w = jax.nn.softmax(scores, axis=-1)
        heads.append(w @ vs)
    rep = jnp.concatenate(heads, axis=-1)
    return rep @ params["wo"] + params["bo"]


if __name__ == "__main__":
    B, S, E, H = 2, 8, 32, 4   # batch, seq, embedding_dim, num_heads (head_dim = 8)

    root = jax.random.PRNGKey(0)
    k_q, k_k, k_v, k_p = jax.random.split(root, 4)
    query = jax.random.normal(k_q, (B, S, E), dtype=jnp.float32)
    key_ = jax.random.normal(k_k, (B, S, E), dtype=jnp.float32)
    value = jax.random.normal(k_v, (B, S, E), dtype=jnp.float32)
    params = init_params(k_p, E, H)

    out = multi_head_attention(query, key_, value, params, num_heads=H)
    out = jax.block_until_ready(out)

    ref = reference_mha(query, key_, value, params, num_heads=H)
    assert out.shape == (B, S, E)
    # bf16 matmul operands (f32 accumulation) vs. pure-f32 reference -> loose tolerance.
    assert jnp.allclose(out, ref, atol=5e-2, rtol=5e-2), "mismatch vs JAX reference"

    print("KERNEL_OK")
</pallas_src>

<mosaic_0001>
module attributes {stable_mosaic.version = 11 : i64} {
  func.func @_projection_kernel(%arg0: i32, %arg1: i32, %arg2: memref<1x8x32xbf16, #tpu.memory_space<vmem>>, %arg3: memref<1x8x32xbf16, #tpu.memory_space<vmem>>, %arg4: memref<1x8x32xbf16, #tpu.memory_space<vmem>>, %arg5: memref<32x32xbf16, #tpu.memory_space<vmem>>, %arg6: memref<1x32xf32, #tpu.memory_space<vmem>>, %arg7: memref<32x32xbf16, #tpu.memory_space<vmem>>, %arg8: memref<1x32xf32, #tpu.memory_space<vmem>>, %arg9: memref<32x32xbf16, #tpu.memory_space<vmem>>, %arg10: memref<1x32xf32, #tpu.memory_space<vmem>>, %arg11: memref<1x8x32xbf16, #tpu.memory_space<vmem>>, %arg12: memref<1x8x32xbf16, #tpu.memory_space<vmem>>, %arg13: memref<1x8x32xbf16, #tpu.memory_space<vmem>>) attributes {dimension_semantics = [#tpu.dimension_semantics<parallel>, #tpu.dimension_semantics<parallel>], iteration_bounds = array<i64: 2, 1>, scalar_prefetch = 0 : i64, scratch_operands = 0 : i64, tpu.core_type = #tpu.core_type<tc>, window_params = [{transform_indices = @transform_0, window_bounds = array<i64: 1, 8, 32>}, {transform_indices = @transform_1, window_bounds = array<i64: 1, 8, 32>}, {transform_indices = @transform_2, window_bounds = array<i64: 1, 8, 32>}, {pipeline_mode = #tpu.pipeline_mode<synchronous>, transform_indices = @transform_3, window_bounds = array<i64: 32, 32>}, {pipeline_mode = #tpu.pipeline_mode<synchronous>, transform_indices = @transform_4, window_bounds = array<i64: 1, 32>}, {pipeline_mode = #tpu.pipeline_mode<synchronous>, transform_indices = @transform_5, window_bounds = array<i64: 32, 32>}, {pipeline_mode = #tpu.pipeline_mode<synchronous>, transform_indices = @transform_6, window_bounds = array<i64: 1, 32>}, {pipeline_mode = #tpu.pipeline_mode<synchronous>, transform_indices = @transform_7, window_bounds = array<i64: 32, 32>}, {pipeline_mode = #tpu.pipeline_mode<synchronous>, transform_indices = @transform_8, window_bounds = array<i64: 1, 32>}, {transform_indices = @transform_9, window_bounds = array<i64: 1, 8, 32>}, {transform_indices = @transform_10, window_bounds = array<i64: 1, 8, 32>}, {transform_indices = @transform_11, window_bounds = array<i64: 1, 8, 32>}]} {
    %c0 = arith.constant 0 : index
    %c0_0 = arith.constant 0 : index
    %c0_1 = arith.constant 0 : index
    %0 = vector.load %arg2[%c0, %c0_0, %c0_1] : memref<1x8x32xbf16, #tpu.memory_space<vmem>>, vector<1x8x32xbf16>
    %1 = vector.shape_cast %0 : vector<1x8x32xbf16> to vector<8x32xbf16>
    %c0_2 = arith.constant 0 : index
    %c0_3 = arith.constant 0 : index
    %2 = vector.load %arg5[%c0_2, %c0_3] : memref<32x32xbf16, #tpu.memory_space<vmem>>, vector<32x32xbf16>
    %cst = arith.constant dense<0.000000e+00> : vector<8x32xf32>
    %3 = tpu.matmul %1, %2, %cst {dimension_numbers = #tpu.dot_dimension_numbers<[1], [0], [0], [1], [0, 0, 1, 1], [], []>} : vector<8x32xbf16>, vector<32x32xbf16>, vector<8x32xf32> -> vector<8x32xf32>
    %c0_4 = arith.constant 0 : index
    %c0_5 = arith.constant 0 : index
    %4 = vector.load %arg6[%c0_4, %c0_5] : memref<1x32xf32, #tpu.memory_space<vmem>>, vector<1x32xf32>
    %5 = vector.broadcast %4 : vector<1x32xf32> to vector<8x32xf32>
    %6 = arith.addf %3, %5 : vector<8x32xf32>
    %cst_6 = arith.constant 0.353553385 : f32
    %7 = vector.broadcast %cst_6 : f32 to vector<8x32xf32>
    %8 = arith.mulf %6, %7 : vector<8x32xf32>
    %9 = arith.truncf %8 : vector<8x32xf32> to vector<8x32xbf16>
    %c0_7 = arith.constant 0 : index
    %c0_8 = arith.constant 0 : index
    %c0_9 = arith.constant 0 : index
    %10 = vector.load %arg11[%c0_7, %c0_8, %c0_9] : memref<1x8x32xbf16, #tpu.memory_space<vmem>>, vector<1x8x32xbf16>
    %11 = vector.shape_cast %10 : vector<1x8x32xbf16> to vector<8x32xbf16>
    %12 = vector.shape_cast %9 : vector<8x32xbf16> to vector<1x8x32xbf16>
    tpu.vector_store %arg11[%c0_7, %c0_8, %c0_9], %12 {strides = array<i32>} : memref<1x8x32xbf16, #tpu.memory_space<vmem>>, vector<1x8x32xbf16>,
    %c0_10 = arith.constant 0 : index
    %c0_11 = arith.constant 0 : index
    %c0_12 = arith.constant 0 : index
    %13 = vector.load %arg3[%c0_10, %c0_11, %c0_12] : memref<1x8x32xbf16, #tpu.memory_space<vmem>>, vector<1x8x32xbf16>
    %14 = vector.shape_cast %13 : vector<1x8x32xbf16> to vector<8x32xbf16>
    %c0_13 = arith.constant 0 : index
    %c0_14 = arith.constant 0 : index
    %15 = vector.load %arg7[%c0_13, %c0_14] : memref<32x32xbf16, #tpu.memory_space<vmem>>, vector<32x32xbf16>
    %cst_15 = arith.constant dense<0.000000e+00> : vector<8x32xf32>
    %16 = tpu.matmul %14, %15, %cst_15 {dimension_numbers = #tpu.dot_dimension_numbers<[1], [0], [0], [1], [0, 0, 1, 1], [], []>} : vector<8x32xbf16>, vector<32x32xbf16>, vector<8x32xf32> -> vector<8x32xf32>
    %c0_16 = arith.constant 0 : index
    %c0_17 = arith.constant 0 : index
    %17 = vector.load %arg8[%c0_16, %c0_17] : memref<1x32xf32, #tpu.memory_space<vmem>>, vector<1x32xf32>
    %18 = vector.broadcast %17 : vector<1x32xf32> to vector<8x32xf32>
    %19 = arith.addf %16, %18 : vector<8x32xf32>
    %20 = arith.truncf %19 : vector<8x32xf32> to vector<8x32xbf16>
    %c0_18 = arith.constant 0 : index
    %c0_19 = arith.constant 0 : index
    %c0_20 = arith.constant 0 : index
    %21 = vector.load %arg12[%c0_18, %c0_19, %c0_20] : memref<1x8x32xbf16, #tpu.memory_space<vmem>>, vector<1x8x32xbf16>
    %22 = vector.shape_cast %21 : vector<1x8x32xbf16> to vector<8x32xbf16>
    %23 = vector.shape_cast %20 : vector<8x32xbf16> to vector<1x8x32xbf16>
    tpu.vector_store %arg12[%c0_18, %c0_19, %c0_20], %23 {strides = array<i32>} : memref<1x8x32xbf16, #tpu.memory_space<vmem>>, vector<1x8x32xbf16>,
    %c0_21 = arith.constant 0 : index
    %c0_22 = arith.constant 0 : index
    %c0_23 = arith.constant 0 : index
    %24 = vector.load %arg4[%c0_21, %c0_22, %c0_23] : memref<1x8x32xbf16, #tpu.memory_space<vmem>>, vector<1x8x32xbf16>
    %25 = vector.shape_cast %24 : vector<1x8x32xbf16> to vector<8x32xbf16>
    %c0_24 = arith.constant 0 : index
    %c0_25 = arith.constant 0 : index
    %26 = vector.load %arg9[%c0_24, %c0_25] : memref<32x32xbf16, #tpu.memory_space<vmem>>, vector<32x32xbf16>
    %cst_26 = arith.constant dense<0.000000e+00> : vector<8x32xf32>
    %27 = tpu.matmul %25, %26, %cst_26 {dimension_numbers = #tpu.dot_dimension_numbers<[1], [0], [0], [1], [0, 0, 1, 1], [], []>} : vector<8x32xbf16>, vector<32x32xbf16>, vector<8x32xf32> -> vector<8x32xf32>
    %c0_27 = arith.constant 0 : index
    %c0_28 = arith.constant 0 : index
    %28 = vector.load %arg10[%c0_27, %c0_28] : memref<1x32xf32, #tpu.memory_space<vmem>>, vector<1x32xf32>
    %29 = vector.broadcast %28 : vector<1x32xf32> to vector<8x32xf32>
    %30 = arith.addf %27, %29 : vector<8x32xf32>
    %31 = arith.truncf %30 : vector<8x32xf32> to vector<8x32xbf16>
    %c0_29 = arith.constant 0 : index
    %c0_30 = arith.constant 0 : index
    %c0_31 = arith.constant 0 : index
    %32 = vector.load %arg13[%c0_29, %c0_30, %c0_31] : memref<1x8x32xbf16, #tpu.memory_space<vmem>>, vector<1x8x32xbf16>
    %33 = vector.shape_cast %32 : vector<1x8x32xbf16> to vector<8x32xbf16>
    %34 = vector.shape_cast %31 : vector<8x32xbf16> to vector<1x8x32xbf16>
    tpu.vector_store %arg13[%c0_29, %c0_30, %c0_31], %34 {strides = array<i32>} : memref<1x8x32xbf16, #tpu.memory_space<vmem>>, vector<1x8x32xbf16>,
    return
  }
  func.func @transform_0(%arg0: i32, %arg1: i32) -> (i32, i32, i32) {
    %c0_i32 = arith.constant 0 : i32
    %c0_i32_0 = arith.constant 0 : i32
    return %arg0, %arg1, %c0_i32 : i32, i32, i32
  }
  func.func @transform_1(%arg0: i32, %arg1: i32) -> (i32, i32, i32) {
    %c0_i32 = arith.constant 0 : i32
    %c0_i32_0 = arith.constant 0 : i32
    return %arg0, %arg1, %c0_i32 : i32, i32, i32
  }
  func.func @transform_2(%arg0: i32, %arg1: i32) -> (i32, i32, i32) {
    %c0_i32 = arith.constant 0 : i32
    %c0_i32_0 = arith.constant 0 : i32
    return %arg0, %arg1, %c0_i32 : i32, i32, i32
  }
  func.func @transform_3(%arg0: i32, %arg1: i32) -> (i32, i32) {
    %c0_i32 = arith.constant 0 : i32
    %c0_i32_0 = arith.constant 0 : i32
    %c0_i32_1 = arith.constant 0 : i32
    return %c0_i32, %c0_i32_0 : i32, i32
  }
  func.func @transform_4(%arg0: i32, %arg1: i32) -> (i32, i32) {
    %c0_i32 = arith.constant 0 : i32
    %c0_i32_0 = arith.constant 0 : i32
    %c0_i32_1 = arith.constant 0 : i32
    return %c0_i32, %c0_i32_0 : i32, i32
  }
  func.func @transform_5(%arg0: i32, %arg1: i32) -> (i32, i32) {
    %c0_i32 = arith.constant 0 : i32
    %c0_i32_0 = arith.constant 0 : i32
    %c0_i32_1 = arith.constant 0 : i32
    return %c0_i32, %c0_i32_0 : i32, i32
  }
  func.func @transform_6(%arg0: i32, %arg1: i32) -> (i32, i32) {
    %c0_i32 = arith.constant 0 : i32
    %c0_i32_0 = arith.constant 0 : i32
    %c0_i32_1 = arith.constant 0 : i32
    return %c0_i32, %c0_i32_0 : i32, i32
  }
  func.func @transform_7(%arg0: i32, %arg1: i32) -> (i32, i32) {
    %c0_i32 = arith.constant 0 : i32
    %c0_i32_0 = arith.constant 0 : i32
    %c0_i32_1 = arith.constant 0 : i32
    return %c0_i32, %c0_i32_0 : i32, i32
  }
  func.func @transform_8(%arg0: i32, %arg1: i32) -> (i32, i32) {
    %c0_i32 = arith.constant 0 : i32
    %c0_i32_0 = arith.constant 0 : i32
    %c0_i32_1 = arith.constant 0 : i32
    return %c0_i32, %c0_i32_0 : i32, i32
  }
  func.func @transform_9(%arg0: i32, %arg1: i32) -> (i32, i32, i32) {
    %c0_i32 = arith.constant 0 : i32
    %c0_i32_0 = arith.constant 0 : i32
    return %arg0, %arg1, %c0_i32 : i32, i32, i32
  }
  func.func @transform_10(%arg0: i32, %arg1: i32) -> (i32, i32, i32) {
    %c0_i32 = arith.constant 0 : i32
    %c0_i32_0 = arith.constant 0 : i32
    return %arg0, %arg1, %c0_i32 : i32, i32, i32
  }
  func.func @transform_11(%arg0: i32, %arg1: i32) -> (i32, i32, i32) {
    %c0_i32 = arith.constant 0 : i32
    %c0_i32_0 = arith.constant 0 : i32
    return %arg0, %arg1, %c0_i32 : i32, i32, i32
  }
}

module attributes {stable_mosaic.version = 11 : i64} {
  func.func @_projection_kernel(%arg0: i32, %arg1: i32, %arg2: memref<1x8x32xbf16, #tpu.memory_space<vmem>>, %arg3: memref<1x8x32xbf16, #tpu.memory_space<vmem>>, %arg4: memref<1x8x32xbf16, #tpu.memory_space<vmem>>, %arg5: memref<32x32xbf16, #tpu.memory_space<vmem>>, %arg6: memref<1x32xf32, #tpu.memory_space<vmem>>, %arg7: memref<32x32xbf16, #tpu.memory_space<vmem>>, %arg8: memref<1x32xf32, #tpu.memory_space<vmem>>, %arg9: memref<32x32xbf16, #tpu.memory_space<vmem>>, %arg10: memref<1x32xf32, #tpu.memory_space<vmem>>, %arg11: memref<1x8x32xbf16, #tpu.memory_space<vmem>>, %arg12: memref<1x8x32xbf16, #tpu.memory_space<vmem>>, %arg13: memref<1x8x32xbf16, #tpu.memory_space<vmem>>) attributes {dimension_semantics = [#tpu.dimension_semantics<parallel>, #tpu.dimension_semantics<parallel>], iteration_bounds = array<i64: 2, 1>, scalar_prefetch = 0 : i64, scratch_operands = 0 : i64, tpu.core_type = #tpu.core_type<tc>, window_params = [{transform_indices = @transform_0, window_bounds = array<i64: 1, 8, 32>}, {transform_indices = @transform_1, window_bounds = array<i64: 1, 8, 32>}, {transform_indices = @transform_2, window_bounds = array<i64: 1, 8, 32>}, {pipeline_mode = #tpu.pipeline_mode<synchronous>, transform_indices = @transform_3, window_bounds = array<i64: 32, 32>}, {pipeline_mode = #tpu.pipeline_mode<synchronous>, transform_indices = @transform_4, window_bounds = array<i64: 1, 32>}, {pipeline_mode = #tpu.pipeline_mode<synchronous>, transform_indices = @transform_5, window_bounds = array<i64: 32, 32>}, {pipeline_mode = #tpu.pipeline_mode<synchronous>, transform_indices = @transform_6, window_bounds = array<i64: 1, 32>}, {pipeline_mode = #tpu.pipeline_mode<synchronous>, transform_indices = @transform_7, window_bounds = array<i64: 32, 32>}, {pipeline_mode = #tpu.pipeline_mode<synchronous>, transform_indices = @transform_8, window_bounds = array<i64: 1, 32>}, {transform_indices = @transform_9, window_bounds = array<i64: 1, 8, 32>}, {transform_indices = @transform_10, window_bounds = array<i64: 1, 8, 32>}, {transform_indices = @transform_11, window_bounds = array<i64: 1, 8, 32>}]} {
    %c0 = arith.constant 0 : index
    %c0_0 = arith.constant 0 : index
    %c0_1 = arith.constant 0 : index
    %0 = vector.load %arg2[%c0, %c0_0, %c0_1] : memref<1x8x32xbf16, #tpu.memory_space<vmem>>, vector<1x8x32xbf16>
    %1 = vector.shape_cast %0 : vector<1x8x32xbf16> to vector<8x32xbf16>
    %c0_2 = arith.constant 0 : index
    %c0_3 = arith.constant 0 : index
    %2 = vector.load %arg5[%c0_2, %c0_3] : memref<32x32xbf16, #tpu.memory_space<vmem>>, vector<32x32xbf16>
    %cst = arith.constant dense<0.000000e+00> : vector<8x32xf32>
    %3 = tpu.matmul %1, %2, %cst {dimension_numbers = #tpu.dot_dimension_numbers<[1], [0], [0], [1], [0, 0, 1, 1], [], []>} : vector<8x32xbf16>, vector<32x32xbf16>, vector<8x32xf32> -> vector<8x32xf32>
    %c0_4 = arith.constant 0 : index
    %c0_5 = arith.constant 0 : index
    %4 = vector.load %arg6[%c0_4, %c0_5] : memref<1x32xf32, #tpu.memory_space<vmem>>, vector<1x32xf32>
    %5 = vector.broadcast %4 : vector<1x32xf32> to vector<8x32xf32>
    %6 = arith.addf %3, %5 : vector<8x32xf32>
    %cst_6 = arith.constant 0.353553385 : f32
    %7 = vector.broadcast %cst_6 : f32 to vector<8x32xf32>
    %8 = arith.mulf %6, %7 : vector<8x32xf32>
    %9 = arith.truncf %8 : vector<8x32xf32> to vector<8x32xbf16>
    %c0_7 = arith.constant 0 : index
    %c0_8 = arith.constant 0 : index
    %c0_9 = arith.constant 0 : index
    %10 = vector.load %arg11[%c0_7, %c0_8, %c0_9] : memref<1x8x32xbf16, #tpu.memory_space<vmem>>, vector<1x8x32xbf16>
    %11 = vector.shape_cast %10 : vector<1x8x32xbf16> to vector<8x32xbf16>
    %12 = vector.shape_cast %9 : vector<8x32xbf16> to vector<1x8x32xbf16>
    tpu.vector_store %arg11[%c0_7, %c0_8, %c0_9], %12 {strides = array<i32>} : memref<1x8x32xbf16, #tpu.memory_space<vmem>>, vector<1x8x32xbf16>,
    %c0_10 = arith.constant 0 : index
    %c0_11 = arith.constant 0 : index
    %c0_12 = arith.constant 0 : index
    %13 = vector.load %arg3[%c0_10, %c0_11, %c0_12] : memref<1x8x32xbf16, #tpu.memory_space<vmem>>, vector<1x8x32xbf16>
    %14 = vector.shape_cast %13 : vector<1x8x32xbf16> to vector<8x32xbf16>
    %c0_13 = arith.constant 0 : index
    %c0_14 = arith.constant 0 : index
    %15 = vector.load %arg7[%c0_13, %c0_14] : memref<32x32xbf16, #tpu.memory_space<vmem>>, vector<32x32xbf16>
    %cst_15 = arith.constant dense<0.000000e+00> : vector<8x32xf32>
    %16 = tpu.matmul %14, %15, %cst_15 {dimension_numbers = #tpu.dot_dimension_numbers<[1], [0], [0], [1], [0, 0, 1, 1], [], []>} : vector<8x32xbf16>, vector<32x32xbf16>, vector<8x32xf32> -> vector<8x32xf32>
    %c0_16 = arith.constant 0 : index
    %c0_17 = arith.constant 0 : index
    %17 = vector.load %arg8[%c0_16, %c0_17] : memref<1x32xf32, #tpu.memory_space<vmem>>, vector<1x32xf32>
    %18 = vector.broadcast %17 : vector<1x32xf32> to vector<8x32xf32>
    %19 = arith.addf %16, %18 : vector<8x32xf32>
    %20 = arith.truncf %19 : vector<8x32xf32> to vector<8x32xbf16>
    %c0_18 = arith.constant 0 : index
    %c0_19 = arith.constant 0 : index
    %c0_20 = arith.constant 0 : index
    %21 = vector.load %arg12[%c0_18, %c0_19, %c0_20] : memref<1x8x32xbf16, #tpu.memory_space<vmem>>, vector<1x8x32xbf16>
    %22 = vector.shape_cast %21 : vector<1x8x32xbf16> to vector<8x32xbf16>
    %23 = vector.shape_cast %20 : vector<8x32xbf16> to vector<1x8x32xbf16>
    tpu.vector_store %arg12[%c0_18, %c0_19, %c0_20], %23 {strides = array<i32>} : memref<1x8x32xbf16, #tpu.memory_space<vmem>>, vector<1x8x32xbf16>,
    %c0_21 = arith.constant 0 : index
    %c0_22 = arith.constant 0 : index
    %c0_23 = arith.constant 0 : index
    %24 = vector.load %arg4[%c0_21, %c0_22, %c0_23] : memref<1x8x32xbf16, #tpu.memory_space<vmem>>, vector<1x8x32xbf16>
    %25 = vector.shape_cast %24 : vector<1x8x32xbf16> to vector<8x32xbf16>
    %c0_24 = arith.constant 0 : index
    %c0_25 = arith.constant 0 : index
    %26 = vector.load %arg9[%c0_24, %c0_25] : memref<32x32xbf16, #tpu.memory_space<vmem>>, vector<32x32xbf16>
    %cst_26 = arith.constant dense<0.000000e+00> : vector<8x32xf32>
    %27 = tpu.matmul %25, %26, %cst_26 {dimension_numbers = #tpu.dot_dimension_numbers<[1], [0], [0], [1], [0, 0, 1, 1], [], []>} : vector<8x32xbf16>, vector<32x32xbf16>, vector<8x32xf32> -> vector<8x32xf32>
    %c0_27 = arith.constant 0 : index
    %c0_28 = arith.constant 0 : index
    %28 = vector.load %arg10[%c0_27, %c0_28] : memref<1x32xf32, #tpu.memory_space<vmem>>, vector<1x32xf32>
    %29 = vector.broadcast %28 : vector<1x32xf32> to vector<8x32xf32>
    %30 = arith.addf %27, %29 : vector<8x32xf32>
    %31 = arith.truncf %30 : vector<8x32xf32> to vector<8x32xbf16>
    %c0_29 = arith.constant 0 : index
    %c0_30 = arith.constant 0 : index
    %c0_31 = arith.constant 0 : index
    %32 = vector.load %arg13[%c0_29, %c0_30, %c0_31] : memref<1x8x32xbf16, #tpu.memory_space<vmem>>, vector<1x8x32xbf16>
    %33 = vector.shape_cast %32 : vector<1x8x32xbf16> to vector<8x32xbf16>
    %34 = vector.shape_cast %31 : vector<8x32xbf16> to vector<1x8x32xbf16>
    tpu.vector_store %arg13[%c0_29, %c0_30, %c0_31], %34 {strides = array<i32>} : memref<1x8x32xbf16, #tpu.memory_space<vmem>>, vector<1x8x32xbf16>,
    return
  }
  func.func @transform_0(%arg0: i32, %arg1: i32) -> (i32, i32, i32) {
    %c0_i32 = arith.constant 0 : i32
    %c0_i32_0 = arith.constant 0 : i32
    return %arg0, %arg1, %c0_i32 : i32, i32, i32
  }
  func.func @transform_1(%arg0: i32, %arg1: i32) -> (i32, i32, i32) {
    %c0_i32 = arith.constant 0 : i32
    %c0_i32_0 = arith.constant 0 : i32
    return %arg0, %arg1, %c0_i32 : i32, i32, i32
  }
  func.func @transform_2(%arg0: i32, %arg1: i32) -> (i32, i32, i32) {
    %c0_i32 = arith.constant 0 : i32
    %c0_i32_0 = arith.constant 0 : i32
    return %arg0, %arg1, %c0_i32 : i32, i32, i32
  }
  func.func @transform_3(%arg0: i32, %arg1: i32) -> (i32, i32) {
    %c0_i32 = arith.constant 0 : i32
    %c0_i32_0 = arith.constant 0 : i32
    %c0_i32_1 = arith.constant 0 : i32
    return %c0_i32, %c0_i32_0 : i32, i32
  }
  func.func @transform_4(%arg0: i32, %arg1: i32) -> (i32, i32) {
    %c0_i32 = arith.constant 0 : i32
    %c0_i32_0 = arith.constant 0 : i32
    %c0_i32_1 = arith.constant 0 : i32
    return %c0_i32, %c0_i32_0 : i32, i32
  }
  func.func @transform_5(%arg0: i32, %arg1: i32) -> (i32, i32) {
    %c0_i32 = arith.constant 0 : i32
    %c0_i32_0 = arith.constant 0 : i32
    %c0_i32_1 = arith.constant 0 : i32
    return %c0_i32, %c0_i32_0 : i32, i32
  }
  func.func @transform_6(%arg0: i32, %arg1: i32) -> (i32, i32) {
    %c0_i32 = arith.constant 0 : i32
    %c0_i32_0 = arith.constant 0 : i32
    %c0_i32_1 = arith.constant 0 : i32
    return %c0_i32, %c0_i32_0 : i32, i32
  }
  func.func @transform_7(%arg0: i32, %arg1: i32) -> (i32, i32) {
    %c0_i32 = arith.constant 0 : i32
    %c0_i32_0 = arith.constant 0 : i32
    %c0_i32_1 = arith.constant 0 : i32
    return %c0_i32, %c0_i32_0 : i32, i32
  }
  func.func @transform_8(%arg0: i32, %arg1: i32) -> (i32, i32) {
    %c0_i32 = arith.constant 0 : i32
    %c0_i32_0 = arith.constant 0 : i32
    %c0_i32_1 = arith.constant 0 : i32
    return %c0_i32, %c0_i32_0 : i32, i32
  }
  func.func @transform_9(%arg0: i32, %arg1: i32) -> (i32, i32, i32) {
    %c0_i32 = arith.constant 0 : i32
    %c0_i32_0 = arith.constant 0 : i32
    return %arg0, %arg1, %c0_i32 : i32, i32, i32
  }
  func.func @transform_10(%arg0: i32, %arg1: i32) -> (i32, i32, i32) {
    %c0_i32 = arith.constant 0 : i32
    %c0_i32_0 = arith.constant 0 : i32
    return %arg0, %arg1, %c0_i32 : i32, i32, i32
  }
  func.func @transform_11(%arg0: i32, %arg1: i32) -> (i32, i32, i32) {
    %c0_i32 = arith.constant 0 : i32
    %c0_i32_0 = arith.constant 0 : i32
    return %arg0, %arg1, %c0_i32 : i32, i32, i32
  }
}

</mosaic_0001>

<bundles_post_ra>
// kernel: tpu_custom_call.1
= control target key start
LH: loop header
LB: loop body
LE: loop exit
PB: predicated region body
PF: predicated region fallthrough
CT: control target
= control target key end

     0   :  { %s1972_s0 = inlined_call_operand.hbm [shape: bf16[2,8,32], index: 0, kind: input, shape index: {}]   ;;  %s1973_s1 = inlined_call_operand.hbm [shape: bf16[2,8,32], index: 1, kind: input, shape index: {}]   ;;  %s1974_s2 = inlined_call_operand.hbm [shape: bf16[2,8,32], index: 2, kind: input, shape index: {}]   ;;  %s1975_s3 = inlined_call_operand.hbm [shape: bf16[32,32], index: 3, kind: input, shape index: {}]   ;;  %s1976_s4 = inlined_call_operand.vmem [shape: f32[1,32], index: 4, kind: input, shape index: {}]   ;;  %s1977_s5 = inlined_call_operand.hbm [shape: bf16[32,32], index: 5, kind: input, shape index: {}]   ;;  %s1978_s6 = inlined_call_operand.vmem [shape: f32[1,32], index: 6, kind: input, shape index: {}]   ;;  %s1979_s7 = inlined_call_operand.hbm [shape: bf16[32,32], index: 7, kind: input, shape index: {}]   ;;  %s1980_s8 = inlined_call_operand.vmem [shape: f32[1,32], index: 8, kind: input, shape index: {}]   ;;  %s1981_s9 = inlined_call_operand.hbm [shape: bf16[2,8,32], index: 9, kind: output, shape index: {0}]   ;;  %s1982_s10 = inlined_call_operand.hbm [shape: bf16[2,8,32], index: 10, kind: output, shape index: {1}]   ;;  %s1983_s11 = inlined_call_operand.hbm [shape: bf16[2,8,32], index: 11, kind: output, shape index: {2}]  }
   0x1   :  { %2004 = sst [smem:[#allocation29_spill]] %s1973_s1 }
   0x2   :  { %2005 = sst [smem:[#allocation30_spill]] %s1975_s3 }
   0x3   :  { %2006 = sst [smem:[#allocation31_spill]] %s1977_s5 }
   0x4   :  { %2007 = sst [smem:[#allocation32_spill]] %s1980_s8 }
   0x5   :  { %2008 = sst [smem:[#allocation33_spill]] %s1981_s9 }
   0x6   :  { %2009 = sst [smem:[#allocation34_spill]] %s1983_s11 }
   0x7   :  { %17 = vsyncpa [#allocation3], 0 }
   0x8   :  { %19 = vsyncpa [#allocation3 + $0x1], 0 }
   0x9   :  { %20 = vsyncpa [#allocation6], 0 }
   0xa   :  { %22 = vsyncpa [#allocation6 + $0x1], 0 }
   0xb   :  { %23 = vsyncpa [#allocation9], 0 }
   0xc   :  { %24 = vsyncpa [#allocation12], 0 }
   0xd   :  { %25 = vsyncpa [#allocation4], 0 }
   0xe   :  { %27 = vsyncpa [#allocation4 + $0x1], 0 }
   0xf   :  { %28 = vsyncpa [#allocation15], 0 }
  0x10   :  { %30 = vsyncpa [#allocation15 + $0x1], 0  ;;  %s1627_s17 = smov 0   ;;  %s1629_s18 = smov 0  }
  0x11   :  { %s1631_s19 = smov 0   ;;  %s1633_s20 = smov 0  }
  0x12   :  { %s1635_s21 = smov 0   ;;  %s1637_s22 = smov 0  }
  0x13 LB: > { %2010 = sst [smem:[#allocation23_spill]] %s1532_s17  ;;  %s1658_s23 = sadd.s32 4294967295, %s1552_s22   ;;  %s1552_s22 = sphi %s1637_s22, %s36_s22   ;;  %s1548_s21 = sphi %s1635_s21, %s2053_s21   ;;  %s1544_s20 = sphi %s1633_s20, %s2052_s20   ;;  %s1540_s19 = sphi %s1631_s19, %s2056_s19   ;;  %s1536_s18 = sphi %s1629_s18, %s2055_s18   ;;  %s1532_s17 = sphi %s1627_s17, %s2054_s17  }
  0x14   : > { %2011 = sst [smem:[#allocation24_spill]] %s1548_s21  ;;  %s1984_s24 = sadd.s32 4294967294, %s1552_s22  }
  0x15   : > { %2012 = sst [smem:[#allocation25_spill]] %s1552_s22  ;;  %p70_p0 = scmp.ne.s32.totalorder %s1536_s18, %s1532_s17 }
  0x16   : > { %p1998_p1 = scmp.eq.s32.totalorder %s1658_s23, 0  ;;  %p284_p3 = scmp.eq.s32.totalorder %s1984_s24, 1 }
  0x17   : > { %p1045_p5 = scmp.ge.s32.totalorder %s1552_s22, 1  ;;  %p347_p7 = scmp.lt.s32.totalorder %s1552_s22, 3 }
  0x18   : > { %p1669_p4 = por %p1998_p1, %p70_p0  ;;  %p1674_p6 = por %p284_p3, %p70_p0 }
  0x19   : > { %p1679_p8 = pnand %p1045_p5, %p347_p7  ;;  %s1554_s28 = smov [#allocation8]  }
  0x1a   : > { %s2013_s25 = scalar_select %p1669_p4, 1, 0 }
  0x1b   : > { %s2014_s26 = scalar_select %p1674_p6, 1, 0 }
  0x1c   : > { %s2016_s27 = scalar_select %p1679_p8, 1, 0 }
  0x1d   : > { %2015 = sst [smem:[#allocation26_spill]] %s2014_s26  ;;  %s359_s29 = sshll.u32 %s1554_s28, 4  ;;  %s360_s29 = int_to_ptr.vmem [resolvable:$true] %s359_s29 }
  0x1e   : > { %p1143_p9 = pneg %p1679_p8  ;;  %s48_s12 = sadd.s32 1, %s1548_s21 }
  0x1f   : > { %s1253_s13 = scalar_lea.vmem %s360_s29, 256  ;;  %p1261_p5 = scmp.lt.s32.totalorder %s360_s29, %s360_s29 }
  0x20   : > { %p1688_p11 = pnand %p1143_p9, %p1998_p1  ;;  %p1254_p13 = scmp.ne.s32.totalorder %s360_s29, %s1253_s13 }
  0x21   : > { %p1262_p7 = scmp.lt.s32.totalorder %s1253_s13, %s1253_s13 }
  0x22   : > { %p1999_p12 = pneg %p1688_p11 }
  0x23   : > { %p1263_p2 = por %p1262_p7, %p1261_p5 }
  0x24   : > { %p1256_p0 = pnand %p1254_p13, %p1999_p12 }
  0x26   : > { %p1257_p3 = pneg %p1256_p0 }
  0x28   : > { %p1264_p10 = pnand %p1263_p2, %p1257_p3 }
  0x2a   : > { %1267 = shalt.err (!%p1264_p10)
}
  0x2b   : > { %s1987_s14 = smov 64   ;;  %s1989_s15 = smov 4  }
  0x2c   : > { %s2018_s3 = sld [smem:[#allocation30_spill]]  ;;  %p50_p2 = scmp.ge.s32.totalorder %s48_s12, 2 }
  0x2d   : > { %s57_s13 = sadd.s32 1, %s1540_s19  ;;  %p64_p9 = scmp.ne.s32.totalorder %s1540_s19, %s1536_s18 }
  0x2e   : > { %p65_p10 = scmp.eq.s32.totalorder %s1552_s22, 0  ;;  %s2058_s12 = smov (%p50_p2, %s48_s12), 0 }
  0x2f   : > { %2019 = sst [smem:[#allocation27_spill]] %s2058_s12  ;;  %p2020_p0 = scmp.eq.s32.totalorder %s1658_s23, 1 }
  0x30   : > { %p66_p13 = por %p65_p10, %p64_p9  ;;  %s52_s26 = ssub.s32 %s1548_s21, %s2058_s12 }
  0x31   : > { %p1714_p3 = por %p2020_p0, %p64_p9  ;;  %p1176_p5 = scmp.lt.s32.totalorder %s1552_s22, 2 }
  0x32   : > { %1146 = dma.hbm_to_vmem [thread:$0]  (!%p1688_p11), %s2018_s3, 256, %s360_s29, [#allocation9], %s1987_s14, %s1987_s14, %s1989_s15  }
  0x33   : > { %s2021_s24 = scalar_select %p1714_p3, 1, 0 }
  0x34   : > { %p55_p7 = scmp.eq.s32.totalorder %s52_s26, 0  ;;  %s1993_s17 = sand.u32 1, %s1540_s19  }
  0x35   : > { %s1724_s29 = sshll.u32 %s1993_s17, 2  ;;  %s1727_s16 = sshll.u32 %s1548_s21, 6 }
  0x36   : > { %s1730_s28 = scalar_select %p55_p7, %s1540_s19, %s57_s13  }
  0x37   : > { %p1732_p2 = pnand %p1176_p5, %p66_p13  ;;  %s427_s15 = sand.u32 1, %s1552_s22  }
  0x38   : > { %2022 = sst [smem:[#allocation28_spill]] %s1730_s28  ;;  %s431_s11 = scalar_lea.vmem [#allocation5], %s1724_s29 }
  0x39   : > { %s2024_s1 = sld [smem:[#allocation29_spill]]  ;;  %s439_s17 = sshll.u32 %s431_s11, 4  ;;  %s440_s17 = int_to_ptr.vmem [resolvable:$true] %s439_s17 }
  0x3a   : > { %s1557_s8 = smov [#allocation10]   ;;  %s1742_s9 = scalar_lea.sflag [#allocation6], %s427_s15 }
  0x3b   : > { %s375_s21 = sshll.u32 %s1557_s8, 4  ;;  %p2000_p9 = pneg %p1732_p2  ;;  %s376_s21 = int_to_ptr.vmem [resolvable:$true] %s375_s21 }
  0x3c   : > { %s1281_s13 = scalar_lea.vmem %s440_s17, 64  ;;  %s1558_s28 = smov [#allocation5]  }
  0x3d   : > { %p1282_p10 = scmp.ne.s32.totalorder %s440_s17, %s1281_s13  ;;  %s1286_s22 = sshll.u32 %s1558_s28, 4  ;;  %s1287_s22 = int_to_ptr.vmem [resolvable:$false] %s1286_s22 }
  0x3e   : > { %s1288_s3 = scalar_lea.vmem %s1287_s22, 128  ;;  %p1289_p5 = scmp.lt.s32.totalorder %s440_s17, %s1287_s22 }
  0x3f   : > { %s437_s26 = scalar_lea.hbm %s2024_s1, %s1727_s16  ;;  %p1284_p13 = pnand %p1282_p10, %p2000_p9 }
  0x40   : > { %p1290_p7 = scmp.lt.s32.totalorder %s1288_s3, %s1281_s13 }
  0x41   : > { %p1285_p0 = pneg %p1284_p13 }
  0x42   : > { %p1291_p1 = por %p1290_p7, %p1289_p5 }
  0x44   : > { %p1292_p12 = pnand %p1291_p1, %p1285_p0 }
  0x46   : > { %1295 = shalt.err (!%p1292_p12)
}
  0x47   : > { %1159 = dma.hbm_to_vmem [thread:$0]  (!%p1732_p2), %s437_s26, 64, %s440_s17, %s1742_s9  }
  0x48   : > { %s1307_s8 = scalar_lea.vmem %s376_s21, 256  ;;  %p2025_p10 = pneg %p1688_p11 }
  0x49   : > { %p1308_p6 = scmp.ne.s32.totalorder %s376_s21, %s1307_s8  ;;  %p1315_p3 = scmp.lt.s32.totalorder %s376_s21, %s376_s21 }
  0x4a   : > { %p1316_p4 = scmp.lt.s32.totalorder %s1307_s8, %s1307_s8 }
  0x4b   : > { %p1310_p13 = pnand %p1308_p6, %p2025_p10 }
  0x4c   : > { %p1317_p8 = por %p1316_p4, %p1315_p3 }
  0x4d   : > { %p1311_p9 = pneg %p1310_p13 }
  0x4f   : > { %p1318_p5 = pnand %p1317_p8, %p1311_p9 }
  0x51   : > { %1321 = shalt.err (!%p1318_p5)
}
  0x52   : > { %s2026_s11 = smov 4   ;;  %s2027_s22 = smov 64  }
  0x53   : > { %s2028_s5 = sld [smem:[#allocation31_spill]]  ;;  %s1559_s17 = smov [#allocation11]  }
  0x54   : > { %s391_s28 = sshll.u32 %s1559_s17, 4  ;;  %p2029_p6 = pmov %p2025_p10  ;;  %s392_s28 = int_to_ptr.vmem [resolvable:$true] %s391_s28 }
  0x55   : > { %s1333_s26 = scalar_lea.vmem %s392_s28, 256  ;;  %p1341_p12 = scmp.lt.s32.totalorder %s392_s28, %s392_s28 }
  0x56   : > { %p1334_p1 = scmp.ne.s32.totalorder %s392_s28, %s1333_s26  ;;  %p1342_p3 = scmp.lt.s32.totalorder %s1333_s26, %s1333_s26 }
  0x58   : > { %p1336_p4 = pnand %p1334_p1, %p2029_p6  ;;  %p1343_p9 = por %p1342_p3, %p1341_p12 }
  0x59   : > { %1149 = dma.hbm_to_vmem [thread:$0]  (!%p1688_p11), %s2028_s5, 256, %s376_s21, [#allocation9], %s2027_s22, %s2027_s22, %s2026_s11  }
  0x5a   : > { %p1337_p8 = pneg %p1336_p4 }
  0x5c   : > { %p1344_p0 = pnand %p1343_p9, %p1337_p8 }
  0x5e   : > { %1347 = shalt.err (!%p1344_p0)
}
  0x5f   : > { %1152 = dma.hbm_to_vmem [thread:$0]  (!%p1688_p11), %s1979_s7, 256, %s392_s28, [#allocation12], %s2027_s22, %s2027_s22, %s2026_s11  }
  0x60   : > { %s418_s12 = scalar_lea.hbm %s1972_s0, %s1727_s16  ;;  %s412_s15 = scalar_lea.vmem [#allocation2], %s1724_s29 }
  0x61   : > { %s420_s17 = sshll.u32 %s412_s15, 4  ;;  %s2030_s26 = sand.u32 1, %s1540_s19   ;;  %s421_s17 = int_to_ptr.vmem [resolvable:$true] %s420_s17 }
  0x62   : > { %s409_s30 = scalar_lea.sflag [#allocation3], %s2030_s26  ;;  %s1361_s1 = scalar_lea.vmem %s421_s17, 64 }
  0x63   : > { %p1362_p7 = scmp.ne.s32.totalorder %s421_s17, %s1361_s1  ;;  %p2031_p10 = pneg %p1732_p2 }
  0x64   : > { %s1560_s21 = smov [#allocation2]  }
  0x65   : > { %p1364_p13 = pnand %p1362_p7, %p2031_p10  ;;  %s1366_s13 = sshll.u32 %s1560_s21, 4  ;;  %s1367_s13 = int_to_ptr.vmem [resolvable:$false] %s1366_s13 }
  0x66   : > { %s1368_s5 = scalar_lea.vmem %s1367_s13, 128  ;;  %p1369_p11 = scmp.lt.s32.totalorder %s421_s17, %s1367_s13 }
  0x67   : > { %p1365_p5 = pneg %p1364_p13  ;;  %p1370_p1 = scmp.lt.s32.totalorder %s1368_s5, %s1361_s1 }
  0x69   : > { %p1371_p6 = por %p1370_p1, %p1369_p11 }
  0x6b   : > { %p1372_p4 = pnand %p1371_p6, %p1365_p5 }
  0x6d   : > { %1375 = shalt.err (!%p1372_p4)
}
  0x6e   : > { %1156 = dma.hbm_to_vmem [thread:$0]  (!%p1732_p2), %s418_s12, 64, %s421_s17, %s409_s30  }
  0x6f   : > { %s456_s28 = scalar_lea.hbm %s1974_s2, %s1727_s16  ;;  %s450_s3 = scalar_lea.vmem [#allocation7], %s1724_s29 }
  0x70   : > { %s458_s8 = sshll.u32 %s450_s3, 4  ;;  %p2032_p12 = pmov %p2031_p10  ;;  %s459_s8 = int_to_ptr.vmem [resolvable:$true] %s458_s8 }
  0x71   : > { %s1389_s15 = scalar_lea.vmem %s459_s8, 64  ;;  %s1561_s1 = smov [#allocation7]  }
  0x72   : > { %p1390_p8 = scmp.ne.s32.totalorder %s459_s8, %s1389_s15  ;;  %s1394_s5 = sshll.u32 %s1561_s1, 4  ;;  %s1395_s5 = int_to_ptr.vmem [resolvable:$false] %s1394_s5 }
  0x73   : > { %s1396_s26 = scalar_lea.vmem %s1395_s5, 128  ;;  %p1397_p0 = scmp.lt.s32.totalorder %s459_s8, %s1395_s5 }
  0x74   : > { %p1392_p3 = pnand %p1390_p8, %p2032_p12  ;;  %p1398_p7 = scmp.lt.s32.totalorder %s1396_s26, %s1389_s15 }
  0x76   : > { %p1393_p9 = pneg %p1392_p3  ;;  %p1399_p10 = por %p1398_p7, %p1397_p0 }
  0x78   : > { %p1400_p13 = pnand %p1399_p10, %p1393_p9 }
  0x7a   : > { %1403 = shalt.err (!%p1400_p13)
}
  0x7b   : > { %1162 = dma.hbm_to_vmem [thread:$0]  (!%p1732_p2), %s456_s28, 64, %s459_s8, %s1742_s9  }
  0x7c   : > { %p2033_p5 = scmp.ne.s32.totalorder %s2016_s27, 0 }
  0x7d   : > { %s1800_s29 = sand.u32 (!%p2033_p5), 1, %s1536_s18   ;;  %p2034_p11 = scmp.ne.s32.totalorder (!%p2033_p5), %s2013_s25, 0 }
  0x7e   : > { %467 = sbr.rel (%p2033_p5) target bundleno = 408 (0x198), region = 56  ;;  %s1803_s16 = sshll.u32 (!%p2033_p5), %s1800_s29, 2 }
  0x7f   : > { %s470_s12 = scalar_lea.sflag (!%p2033_p5), [#allocation3], %s1800_s29  ;;  %s473_s17 = scalar_lea.vmem (!%p2033_p5), [#allocation2], %s1803_s16 }
  0x83   : > { %1507 = dma.done.wait (%p2034_p11), %s470_s12, 64  }
  0x84   : > { %1509 = vsyncadd (%p2034_p11), %s470_s12, 4294967232  ;;  %s478_s9 = sand.u32 1, %s1658_s23   ;;  %s482_s14 = scalar_lea.vmem [#allocation5], %s1803_s16 }
  0x85   : > { %s479_s27 = scalar_lea.sflag [#allocation6], %s478_s9 }
  0x86   : > { %1511 = dma.done.wait (%p2034_p11), %s479_s27, 128  }
  0x87   : > { %1513 = vsyncadd (%p2034_p11), %s479_s27, 4294967168  ;;  %s491_s30 = scalar_lea.vmem [#allocation7], %s1803_s16  ;;  %p2035_p2 = scmp.eq.s32.totalorder %s1658_s23, 0 }
  0x89   : > { %1515 = dma.done.wait (%p2035_p2), [#allocation9], 512   ;;  %p2036_p1 = pmov %p2035_p2 }
  0x8b   : > { %1517 = vsyncadd (%p2036_p1), [#allocation9], 4294966784  ;;  %p2037_p6 = pmov %p2036_p1 }
  0x8c   : > { %p2038_p4 = pmov %p2036_p1 }
  0x8d   : > { %1519 = dma.done.wait (%p2037_p6), [#allocation12], 256  }
  0x8e   : > { %1521 = vsyncadd (%p2038_p4), [#allocation12], 4294967040  ;;  %v1562_v0 = vmov 0.0   ;;  %vm1563_vm0 = vmmov 0   ;;  %v1236_v1 = vld [vmem:[#allocation8 + $0x8] sm:$0xff]   ;;  %v1237_v2 = vld [vmem:[#allocation10 + $0x8] sm:$0xff]  }
  0x8f   : > { %1095 = vmatprep.subr.bf16.mxu0 %v1562_v0  ;;  %1103 = vmatprep.subr.bf16.mxu1 %v1562_v0  ;;  %v1238_v3 = vld [vmem:[#allocation8] sm:$0xff]   ;;  %v1239_v4 = vld [vmem:[#allocation10] sm:$0xff]   ;;  %v563_v5 = vld [vmem:[%s473_s17] sm:$0xf]  ;;  %vm587_vm1 = vcmask 261120   ;;  %s1840_s22 = sshll.u32 %s1544_s20, 6 }
  0x90   : > { %1099 = vmatprep.mubr.msk.bf16.mxu0 %vm1563_vm0, %v1562_v0  ;;  %1107 = vmatprep.mubr.msk.bf16.mxu1 %vm1563_vm0, %v1562_v0  ;;  %v1240_v6 = vld [vmem:[#allocation11 + $0x8] sm:$0xff]   ;;  %v635_v7 = vld [vmem:[%s482_s14] sm:$0xf]  ;;  %v1241_v8 = vld [vmem:[#allocation11] sm:$0xff]   ;;  %s554_s28 = scalar_lea.vmem [#allocation14], %s1803_s16  ;;  %s547_s8 = scalar_lea.vmem [#allocation13], %s1803_s16 }
  0x91   : > { %1096 = vmatpush3.bf16.msra.mxu0 %v1236_v1  ;;  %1104 = vmatpush3.bf16.msra.mxu1 %v1237_v2  ;;  %v704_v9 = vld [vmem:[%s491_s30] sm:$0xf]  ;;  %v1066_v10 = vld [vmem:[%s1976_s4] ss:$0 sm:$0xff]  ;;  %s812_s3 = sshll.u32 %s554_s28, 4  ;;  %s798_s15 = sshll.u32 %s547_s8, 4  ;;  %s1852_s3 = int_to_ptr.vmem [resolvable:$true] %s812_s3  ;;  %s1860_s15 = int_to_ptr.vmem [resolvable:$true] %s798_s15 }
  0x92   : > { %1097 = vmatprep.subr.bf16.mxu0 %v1562_v0  ;;  %1105 = vmatprep.subr.bf16.mxu1 %v1562_v0  ;;  %v1070_v11 = vld [vmem:[%s1978_s6] ss:$0 sm:$0xff]  ;;  %s1850_s20 = scalar_lea.hbm %s1982_s10, %s1840_s22  ;;  %vm633_vm2 = vcmask 257024   ;;  %s2039_s17 = sld [smem:[#allocation33_spill]] }
  0x93   : > { %s2041_s21 = sld [smem:[#allocation32_spill]]  ;;  %s561_s13 = scalar_lea.vmem [#allocation16], %s1803_s16 }
  0x94   : > { %s1869_s11 = sshll.u32 %s561_s13, 4  ;;  %s1873_s1 = scalar_lea.sflag [#allocation15], %s478_s9  ;;  %s827_s11 = int_to_ptr.vmem [resolvable:$true] %s1869_s11 }
  0x95   : > { %1098 = vmatpush3.bf16.msra.mxu0 %v1238_v3  ;;  %1106 = vmatpush3.bf16.msra.mxu1 %v1239_v4  ;;  %s1404_s5 = scalar_lea.vmem %s1852_s3, 64  ;;  %p2042_p12 = scmp.ne.s32.totalorder %s2021_s24, 0 }
  0x96   : > { %1111 = vmatprep.subr.bf16.mxu0 %v1562_v0  ;;  %p1405_p8 = scmp.ne.s32.totalorder %s1852_s3, %s1404_s5  ;;  %s1564_s26 = smov [#allocation14]  }
  0x97   : > { %s1408_s12 = sshll.u32 %s1564_s26, 4  ;;  %s1409_s12 = int_to_ptr.vmem [resolvable:$false] %s1408_s12 }
  0x98   : > { %1100 = vmatmul.mubr.msk.bf16.vlgmr.msra.gmra.mxu0 %vm587_vm1, %v563_v5  ;;  %1108 = vmatmul.mubr.msk.bf16.vlgmr.msra.gmra.mxu1 %vm587_vm1, %v635_v7  ;;  %s2040_s27 = smov %s2039_s17  ;;  %s1858_s14 = scalar_lea.hbm %s2039_s17, %s1840_s22 }
  0x99   : > { %1112 = vmatpush3.bf16.msra.mxu0 %v1240_v6  ;;  %1115 = vmatprep.mubr.msk.bf16.mxu0 %vm1563_vm0, %v1562_v0  ;;  %v1074_v24 = vld [vmem:[%s2041_s21] ss:$0 sm:$0xff]  ;;  %p1406_p3 = pnand %p1405_p8, %p2042_p12  ;;  %s1410_s17 = scalar_lea.vmem %s1409_s12, 128 }
  0x9a   : > { %1113 = vmatprep.subr.bf16.mxu0 %v1562_v0  ;;  %p1411_p0 = scmp.lt.s32.totalorder %s1852_s3, %s1409_s12  ;;  %p1412_p7 = scmp.lt.s32.totalorder %s1410_s17, %s1404_s5 }
  0x9b   : > { %p1407_p9 = pneg %p1406_p3 }
  0x9c   : > { %p1413_p10 = por %p1412_p7, %p1411_p0 }
  0x9d   : > { %1114 = vmatpush3.bf16.msra.mxu0 %v1241_v8 }
  0x9e   : > { %p1414_p13 = pnand %p1413_p10, %p1407_p9 }
  0xa0   : > { %1116 = vmatmul.mubr.msk.bf16.vlgmr.msra.gmra.mxu0 %vm587_vm1, %v704_v9 }
 0x158   : > { %v625_v12 = vpop.f32.mrf.mxu0  ;;  %v696_v14 = vpop.f32.mrf.mxu1 }
 0x159   : > { %v626_v13 = vadd.f32 %v1066_v10, %v625_v12  ;;  %v697_v16 = vadd.f32 %v1070_v11, %v696_v14 }
 0x15a   : > { %v1101_v15 = vpop.f32.mrf.mxu0  ;;  %v1109_v18 = vpop.f32.mrf.mxu1 }
 0x15b   : > { %v631_v17 = vmul.f32 0.35355338, %v626_v13  ;;  %v702_v19 = vpack.c.bf16 %v697_v16, %v697_v16 }
 0x15c   : > { %v628_v20 = vpop.f32.mrf.mxu0  ;;  %v699_v22 = vpop.f32.mrf.mxu1 }
 0x15d   : > { %v632_v21 = vpack.c.bf16 %v631_v17, %v631_v17  ;;  %703 = vst.msk [vmem:[%s554_s28] sm:$0xf] %vm633_vm2, %v702_v19 }
 0x15e   : > { %v1102_v23 = vpop.f32.mrf.mxu0  ;;  %v1110_v25 = vpop.f32.mrf.mxu1 }
 0x15f   : > { %1417 = shalt.err (!%p1414_p13)
}
 0x160   : > { %s1418_s23 = scalar_lea.hbm %s1850_s20, 64  ;;  %s1422_s30 = scalar_lea.hbm %s1982_s10, 128 }
 0x161   : > { %p1419_p5 = scmp.ne.s32.totalorder %s1850_s20, %s1418_s23  ;;  %p1423_p1 = scmp.lt.s32.totalorder %s1850_s20, %s1982_s10 }
 0x162   : > { %p1424_p6 = scmp.lt.s32.totalorder %s1422_s30, %s1418_s23 }
 0x163   : > { %p1420_p11 = pnand %p1419_p5, %p2042_p12 }
 0x164   : > { %p1425_p4 = por %p1424_p6, %p1423_p1 }
 0x165   : > { %p1421_p2 = pneg %p1420_p11 }
 0x167   : > { %p1426_p8 = pnand %p1425_p4, %p1421_p2 }
 0x169   : > { %1429 = shalt.err (!%p1426_p8)
}
 0x16a   : > { %1138 = dma.vmem_to_hbm [thread:$0]  (%p2042_p12), %s1852_s3, 64, %s1850_s20, %s1873_s1   ;;  %634 = vst.msk [vmem:[%s547_s8] sm:$0xf] %vm633_vm2, %v632_v21  ;;  %v765_v26 = vpop.f32.mrf.mxu0 }
 0x16b   : > { %s774_s5 = scalar_lea.sflag [#allocation4], %s1800_s29  ;;  %s1430_s26 = scalar_lea.vmem %s1860_s15, 64 }
 0x16c   : > { %p1431_p3 = scmp.ne.s32.totalorder %s1860_s15, %s1430_s26  ;;  %s1565_s12 = smov [#allocation13]  }
 0x16d   : > { %s1434_s17 = sshll.u32 %s1565_s12, 4  ;;  %s1435_s17 = int_to_ptr.vmem [resolvable:$false] %s1434_s17 }
 0x16e   : > { %p1432_p9 = pnand %p1431_p3, %p2042_p12  ;;  %s1436_s23 = scalar_lea.vmem %s1435_s17, 128 }
 0x16f   : > { %p1437_p7 = scmp.lt.s32.totalorder %s1860_s15, %s1435_s17  ;;  %p1438_p10 = scmp.lt.s32.totalorder %s1436_s23, %s1430_s26 }
 0x170   : > { %p1433_p0 = pneg %p1432_p9 }
 0x171   : > { %p1439_p13 = por %p1438_p10, %p1437_p7 }
 0x173   : > { %p1440_p5 = pnand %p1439_p13, %p1433_p0 }
 0x175   : > { %1443 = shalt.err (!%p1440_p5)
}
 0x176   : > { %s1444_s3 = scalar_lea.hbm %s1858_s14, 64  ;;  %s1448_s20 = scalar_lea.hbm %s2040_s27, 128 }
 0x177   : > { %p1445_p11 = scmp.ne.s32.totalorder %s1858_s14, %s1444_s3  ;;  %p1449_p6 = scmp.lt.s32.totalorder %s1858_s14, %s2040_s27 }
 0x178   : > { %p1450_p4 = scmp.lt.s32.totalorder %s1448_s20, %s1444_s3 }
 0x179   : > { %p1446_p2 = pnand %p1445_p11, %p2042_p12 }
 0x17a   : > { %p1451_p8 = por %p1450_p4, %p1449_p6 }
 0x17b   : > { %p1447_p1 = pneg %p1446_p2 }
 0x17d   : > { %p1452_p3 = pnand %p1451_p8, %p1447_p1 }
 0x17f   : > { %1455 = shalt.err (!%p1452_p3)
}
 0x180   : > { %1137 = dma.vmem_to_hbm [thread:$0]  (%p2042_p12), %s1860_s15, 64, %s1858_s14, %s774_s5   ;;  %v766_v27 = vadd.f32 %v1074_v24, %v765_v26  ;;  %v1117_v28 = vpop.f32.mrf.mxu0 }
 0x181   : > { %s2043_s21 = sld [smem:[#allocation34_spill]]  ;;  %s1456_s17 = scalar_lea.vmem %s827_s11, 64 }
 0x182   : > { %v771_v29 = vpack.c.bf16 %v766_v27, %v766_v27  ;;  %v768_v30 = vpop.f32.mrf.mxu0  ;;  %p1457_p9 = scmp.ne.s32.totalorder %s827_s11, %s1456_s17  ;;  %s1566_s15 = smov [#allocation16]  }
 0x183   : > { %s1460_s14 = sshll.u32 %s1566_s15, 4  ;;  %s1461_s14 = int_to_ptr.vmem [resolvable:$false] %s1460_s14 }
 0x184   : > { %772 = vst.msk [vmem:[%s561_s13] sm:$0xf] %vm633_vm2, %v771_v29  ;;  %v1118_v31 = vpop.f32.mrf.mxu0  ;;  %p1458_p0 = pnand %p1457_p9, %p2042_p12  ;;  %s1462_s5 = scalar_lea.vmem %s1461_s14, 128 }
 0x185   : > { %p1463_p10 = scmp.lt.s32.totalorder %s827_s11, %s1461_s14  ;;  %p1464_p13 = scmp.lt.s32.totalorder %s1462_s5, %s1456_s17 }
 0x186   : > { %p1459_p7 = pneg %p1458_p0 }
 0x187   : > { %s2044_s26 = smov %s2043_s21  ;;  %s1924_s12 = scalar_lea.hbm %s2043_s21, %s1840_s22 }
 0x188   : > { %p1465_p5 = por %p1464_p13, %p1463_p10 }
 0x18a   : > { %p1466_p11 = pnand %p1465_p5, %p1459_p7 }
 0x18c   : > { %1469 = shalt.err (!%p1466_p11)
}
 0x18d   : > { %s1470_s16 = scalar_lea.hbm %s1924_s12, 64  ;;  %s1474_s23 = scalar_lea.hbm %s2044_s26, 128 }
 0x18e   : > { %p1471_p2 = scmp.ne.s32.totalorder %s1924_s12, %s1470_s16  ;;  %p1475_p4 = scmp.lt.s32.totalorder %s1924_s12, %s2044_s26 }
 0x18f   : > { %p1476_p8 = scmp.lt.s32.totalorder %s1474_s23, %s1470_s16 }
 0x190   : > { %p1472_p1 = pnand %p1471_p2, %p2042_p12 }
 0x191   : > { %p1477_p3 = por %p1476_p8, %p1475_p4 }
 0x192   : > { %p1473_p6 = pneg %p1472_p1 }
 0x194   : > { %p1478_p9 = pnand %p1477_p3, %p1473_p6 }
 0x196   : > { %1481 = shalt.err (!%p1478_p9)
}
 0x197   : > { %1139 = dma.vmem_to_hbm [thread:$0]  (%p2042_p12), %s827_s11, 64, %s1924_s12, %s1873_s1  }
 0x198 PF: > { %s2045_s8 = sld [smem:[#allocation23_spill]] }
 0x199   : > { %s2046_s20 = sld [smem:[#allocation26_spill]] }
 0x19a   : > { %s2047_s9 = sld [smem:[#allocation25_spill]] }
 0x19e   : > { %s838_s28 = sand.u32 1, %s2045_s8  }
 0x19f   : > { %p2048_p0 = scmp.ne.s32.totalorder %s2046_s20, 0  ;;  %s839_s30 = scalar_lea.sflag [#allocation4], %s838_s28 }
 0x1a0   : > { %p2049_p7 = scmp.ge.s32.totalorder %s2047_s9, 2 }
 0x1a2   : > { %p1164_p10 = pnand %p2049_p7, %p2048_p0 }
 0x1a4   : > { %p1165_p13 = pneg %p1164_p10 }
 0x1a6   : > { %1523 = dma.done.wait (%p1165_p13), %s839_s30, 64  }
 0x1a7   : > { %1525 = vsyncadd (%p1165_p13), %s839_s30, 4294967232  ;;  %s2050_s25 = sadd.s32 4294967294, %s2047_s9  }
 0x1a8   : > { %s847_s21 = sand.u32 1, %s2050_s25  }
 0x1a9   : > { %s848_s17 = scalar_lea.sflag [#allocation15], %s847_s21 }
 0x1aa   : > { %1527 = dma.done.wait (%p1165_p13), %s848_s17, 128  }
 0x1ab   : > { %1529 = vsyncadd (%p1165_p13), %s848_s17, 4294967168  ;;  %s36_s22 = sadd.s32 1, %s2047_s9   ;;  %s2051_s24 = sld [smem:[#allocation28_spill]] }
 0x1ac   : > { %p33_p12 = scmp.ge.s32.totalorder %s36_s22, 4   ;;  %s2052_s20 = sld [smem:[#allocation24_spill]] }
 0x1ad   : > { %s2053_s21 = sld [smem:[#allocation27_spill]]  ;;  %s2054_s17 = smov %s1536_s18 }
 0x1ae   : > { %s2055_s18 = smov %s1540_s19  ;;  %35 = sbr.rel (!%p33_p12) target bundleno = 19 (0x13), region = 169 }
 0x1b1   : > { %s2056_s19 = smov %s2051_s24 }
 0x1b3   :  { %862 = vsyncpa [#allocation3], 1 }
 0x1b4   :  { %864 = vsyncpa [#allocation3 + $0x1], 1 }
 0x1b5   :  { %865 = vsyncpa [#allocation6], 1 }
 0x1b6   :  { %867 = vsyncpa [#allocation6 + $0x1], 1 }
 0x1b7   :  { %868 = vsyncpa [#allocation9], 1 }
 0x1b8   :  { %869 = vsyncpa [#allocation12], 1 }
 0x1b9   :  { %870 = vsyncpa [#allocation4], 1 }
 0x1ba   :  { %872 = vsyncpa [#allocation4 + $0x1], 1 }
 0x1bb   :  { %873 = vsyncpa [#allocation15], 1 }
 0x1bc   :  { %875 = vsyncpa [#allocation15 + $0x1], 1 }

// kernel: tpu_custom_call.1
= control target key start
LH: loop header
LB: loop body
LE: loop exit
PB: predicated region body
PF: predicated region fallthrough
CT: control target
= control target key end

     0   :  { %s1972_s0 = inlined_call_operand.hbm [shape: bf16[2,8,32], index: 0, kind: input, shape index: {}]   ;;  %s1973_s1 = inlined_call_operand.hbm [shape: bf16[2,8,32], index: 1, kind: input, shape index: {}]   ;;  %s1974_s2 = inlined_call_operand.hbm [shape: bf16[2,8,32], index: 2, kind: input, shape index: {}]   ;;  %s1975_s3 = inlined_call_operand.hbm [shape: bf16[32,32], index: 3, kind: input, shape index: {}]   ;;  %s1976_s4 = inlined_call_operand.vmem [shape: f32[1,32], index: 4, kind: input, shape index: {}]   ;;  %s1977_s5 = inlined_call_operand.hbm [shape: bf16[32,32], index: 5, kind: input, shape index: {}]   ;;  %s1978_s6 = inlined_call_operand.vmem [shape: f32[1,32], index: 6, kind: input, shape index: {}]   ;;  %s1979_s7 = inlined_call_operand.hbm [shape: bf16[32,32], index: 7, kind: input, shape index: {}]   ;;  %s1980_s8 = inlined_call_operand.vmem [shape: f32[1,32], index: 8, kind: input, shape index: {}]   ;;  %s1981_s9 = inlined_call_operand.hbm [shape: bf16[2,8,32], index: 9, kind: output, shape index: {0}]   ;;  %s1982_s10 = inlined_call_operand.hbm [shape: bf16[2,8,32], index: 10, kind: output, shape index: {1}]   ;;  %s1983_s11 = inlined_call_operand.hbm [shape: bf16[2,8,32], index: 11, kind: output, shape index: {2}]  }
   0x1   :  { %2004 = sst [smem:[#allocation29_spill]] %s1973_s1 }
   0x2   :  { %2005 = sst [smem:[#allocation30_spill]] %s1975_s3 }
   0x3   :  { %2006 = sst [smem:[#allocation31_spill]] %s1977_s5 }
   0x4   :  { %2007 = sst [smem:[#allocation32_spill]] %s1980_s8 }
   0x5   :  { %2008 = sst [smem:[#allocation33_spill]] %s1981_s9 }
   0x6   :  { %2009 = sst [smem:[#allocation34_spill]] %s1983_s11 }
   0x7   :  { %17 = vsyncpa [#allocation3], 0 }
   0x8   :  { %19 = vsyncpa [#allocation3 + $0x1], 0 }
   0x9   :  { %20 = vsyncpa [#allocation6], 0 }
   0xa   :  { %22 = vsyncpa [#allocation6 + $0x1], 0 }
   0xb   :  { %23 = vsyncpa [#allocation9], 0 }
   0xc   :  { %24 = vsyncpa [#allocation12], 0 }
   0xd   :  { %25 = vsyncpa [#allocation4], 0 }
   0xe   :  { %27 = vsyncpa [#allocation4 + $0x1], 0 }
   0xf   :  { %28 = vsyncpa [#allocation15], 0 }
  0x10   :  { %30 = vsyncpa [#allocation15 + $0x1], 0  ;;  %s1627_s17 = smov 0   ;;  %s1629_s18 = smov 0  }
  0x11   :  { %s1631_s19 = smov 0   ;;  %s1633_s20 = smov 0  }
  0x12   :  { %s1635_s21 = smov 0   ;;  %s1637_s22 = smov 0  }
  0x13 LB: > { %2010 = sst [smem:[#allocation23_spill]] %s1532_s17  ;;  %s1658_s23 = sadd.s32 4294967295, %s1552_s22   ;;  %s1552_s22 = sphi %s1637_s22, %s36_s22   ;;  %s1548_s21 = sphi %s1635_s21, %s2053_s21   ;;  %s1544_s20 = sphi %s1633_s20, %s2052_s20   ;;  %s1540_s19 = sphi %s1631_s19, %s2056_s19   ;;  %s1536_s18 = sphi %s1629_s18, %s2055_s18   ;;  %s1532_s17 = sphi %s1627_s17, %s2054_s17  }
  0x14   : > { %2011 = sst [smem:[#allocation24_spill]] %s1548_s21  ;;  %s1984_s24 = sadd.s32 4294967294, %s1552_s22  }
  0x15   : > { %2012 = sst [smem:[#allocation25_spill]] %s1552_s22  ;;  %p70_p0 = scmp.ne.s32.totalorder %s1536_s18, %s1532_s17 }
  0x16   : > { %p1998_p1 = scmp.eq.s32.totalorder %s1658_s23, 0  ;;  %p284_p3 = scmp.eq.s32.totalorder %s1984_s24, 1 }
  0x17   : > { %p1045_p5 = scmp.ge.s32.totalorder %s1552_s22, 1  ;;  %p347_p7 = scmp.lt.s32.totalorder %s1552_s22, 3 }
  0x18   : > { %p1669_p4 = por %p1998_p1, %p70_p0  ;;  %p1674_p6 = por %p284_p3, %p70_p0 }
  0x19   : > { %p1679_p8 = pnand %p1045_p5, %p347_p7  ;;  %s1554_s28 = smov [#allocation8]  }
  0x1a   : > { %s2013_s25 = scalar_select %p1669_p4, 1, 0 }
  0x1b   : > { %s2014_s26 = scalar_select %p1674_p6, 1, 0 }
  0x1c   : > { %s2016_s27 = scalar_select %p1679_p8, 1, 0 }
  0x1d   : > { %2015 = sst [smem:[#allocation26_spill]] %s2014_s26  ;;  %s359_s29 = sshll.u32 %s1554_s28, 4  ;;  %s360_s29 = int_to_ptr.vmem [resolvable:$true] %s359_s29 }
  0x1e   : > { %p1143_p9 = pneg %p1679_p8  ;;  %s48_s12 = sadd.s32 1, %s1548_s21 }
  0x1f   : > { %s1253_s13 = scalar_lea.vmem %s360_s29, 256  ;;  %p1261_p5 = scmp.lt.s32.totalorder %s360_s29, %s360_s29 }
  0x20   : > { %p1688_p11 = pnand %p1143_p9, %p1998_p1  ;;  %p1254_p13 = scmp.ne.s32.totalorder %s360_s29, %s1253_s13 }
  0x21   : > { %p1262_p7 = scmp.lt.s32.totalorder %s1253_s13, %s1253_s13 }
  0x22   : > { %p1999_p12 = pneg %p1688_p11 }
  0x23   : > { %p1263_p2 = por %p1262_p7, %p1261_p5 }
  0x24   : > { %p1256_p0 = pnand %p1254_p13, %p1999_p12 }
  0x26   : > { %p1257_p3 = pneg %p1256_p0 }
  0x28   : > { %p1264_p10 = pnand %p1263_p2, %p1257_p3 }
  0x2a   : > { %1267 = shalt.err (!%p1264_p10)
}
  0x2b   : > { %s1987_s14 = smov 64   ;;  %s1989_s15 = smov 4  }
  0x2c   : > { %s2018_s3 = sld [smem:[#allocation30_spill]]  ;;  %p50_p2 = scmp.ge.s32.totalorder %s48_s12, 2 }
  0x2d   : > { %s57_s13 = sadd.s32 1, %s1540_s19  ;;  %p64_p9 = scmp.ne.s32.totalorder %s1540_s19, %s1536_s18 }
  0x2e   : > { %p65_p10 = scmp.eq.s32.totalorder %s1552_s22, 0  ;;  %s2058_s12 = smov (%p50_p2, %s48_s12), 0 }
  0x2f   : > { %2019 = sst [smem:[#allocation27_spill]] %s2058_s12  ;;  %p2020_p0 = scmp.eq.s32.totalorder %s1658_s23, 1 }
  0x30   : > { %p66_p13 = por %p65_p10, %p64_p9  ;;  %s52_s26 = ssub.s32 %s1548_s21, %s2058_s12 }
  0x31   : > { %p1714_p3 = por %p2020_p0, %p64_p9  ;;  %p1176_p5 = scmp.lt.s32.totalorder %s1552_s22, 2 }
  0x32   : > { %1146 = dma.hbm_to_vmem [thread:$0]  (!%p1688_p11), %s2018_s3, 256, %s360_s29, [#allocation9], %s1987_s14, %s1987_s14, %s1989_s15  }
  0x33   : > { %s2021_s24 = scalar_select %p1714_p3, 1, 0 }
  0x34   : > { %p55_p7 = scmp.eq.s32.totalorder %s52_s26, 0  ;;  %s1993_s17 = sand.u32 1, %s1540_s19  }
  0x35   : > { %s1724_s29 = sshll.u32 %s1993_s17, 2  ;;  %s1727_s16 = sshll.u32 %s1548_s21, 6 }
  0x36   : > { %s1730_s28 = scalar_select %p55_p7, %s1540_s19, %s57_s13  }
  0x37   : > { %p1732_p2 = pnand %p1176_p5, %p66_p13  ;;  %s427_s15 = sand.u32 1, %s1552_s22  }
  0x38   : > { %2022 = sst [smem:[#allocation28_spill]] %s1730_s28  ;;  %s431_s11 = scalar_lea.vmem [#allocation5], %s1724_s29 }
  0x39   : > { %s2024_s1 = sld [smem:[#allocation29_spill]]  ;;  %s439_s17 = sshll.u32 %s431_s11, 4  ;;  %s440_s17 = int_to_ptr.vmem [resolvable:$true] %s439_s17 }
  0x3a   : > { %s1557_s8 = smov [#allocation10]   ;;  %s1742_s9 = scalar_lea.sflag [#allocation6], %s427_s15 }
  0x3b   : > { %s375_s21 = sshll.u32 %s1557_s8, 4  ;;  %p2000_p9 = pneg %p1732_p2  ;;  %s376_s21 = int_to_ptr.vmem [resolvable:$true] %s375_s21 }
  0x3c   : > { %s1281_s13 = scalar_lea.vmem %s440_s17, 64  ;;  %s1558_s28 = smov [#allocation5]  }
  0x3d   : > { %p1282_p10 = scmp.ne.s32.totalorder %s440_s17, %s1281_s13  ;;  %s1286_s22 = sshll.u32 %s1558_s28, 4  ;;  %s1287_s22 = int_to_ptr.vmem [resolvable:$false] %s1286_s22 }
  0x3e   : > { %s1288_s3 = scalar_lea.vmem %s1287_s22, 128  ;;  %p1289_p5 = scmp.lt.s32.totalorder %s440_s17, %s1287_s22 }
  0x3f   : > { %s437_s26 = scalar_lea.hbm %s2024_s1, %s1727_s16  ;;  %p1284_p13 = pnand %p1282_p10, %p2000_p9 }
  0x40   : > { %p1290_p7 = scmp.lt.s32.totalorder %s1288_s3, %s1281_s13 }
  0x41   : > { %p1285_p0 = pneg %p1284_p13 }
  0x42   : > { %p1291_p1 = por %p1290_p7, %p1289_p5 }
  0x44   : > { %p1292_p12 = pnand %p1291_p1, %p1285_p0 }
  0x46   : > { %1295 = shalt.err (!%p1292_p12)
}
  0x47   : > { %1159 = dma.hbm_to_vmem [thread:$0]  (!%p1732_p2), %s437_s26, 64, %s440_s17, %s1742_s9  }
  0x48   : > { %s1307_s8 = scalar_lea.vmem %s376_s21, 256  ;;  %p2025_p10 = pneg %p1688_p11 }
  0x49   : > { %p1308_p6 = scmp.ne.s32.totalorder %s376_s21, %s1307_s8  ;;  %p1315_p3 = scmp.lt.s32.totalorder %s376_s21, %s376_s21 }
  0x4a   : > { %p1316_p4 = scmp.lt.s32.totalorder %s1307_s8, %s1307_s8 }
  0x4b   : > { %p1310_p13 = pnand %p1308_p6, %p2025_p10 }
  0x4c   : > { %p1317_p8 = por %p1316_p4, %p1315_p3 }
  0x4d   : > { %p1311_p9 = pneg %p1310_p13 }
  0x4f   : > { %p1318_p5 = pnand %p1317_p8, %p1311_p9 }
  0x51   : > { %1321 = shalt.err (!%p1318_p5)
}
  0x52   : > { %s2026_s11 = smov 4   ;;  %s2027_s22 = smov 64  }
  0x53   : > { %s2028_s5 = sld [smem:[#allocation31_spill]]  ;;  %s1559_s17 = smov [#allocation11]  }
  0x54   : > { %s391_s28 = sshll.u32 %s1559_s17, 4  ;;  %p2029_p6 = pmov %p2025_p10  ;;  %s392_s28 = int_to_ptr.vmem [resolvable:$true] %s391_s28 }
  0x55   : > { %s1333_s26 = scalar_lea.vmem %s392_s28, 256  ;;  %p1341_p12 = scmp.lt.s32.totalorder %s392_s28, %s392_s28 }
  0x56   : > { %p1334_p1 = scmp.ne.s32.totalorder %s392_s28, %s1333_s26  ;;  %p1342_p3 = scmp.lt.s32.totalorder %s1333_s26, %s1333_s26 }
  0x58   : > { %p1336_p4 = pnand %p1334_p1, %p2029_p6  ;;  %p1343_p9 = por %p1342_p3, %p1341_p12 }
  0x59   : > { %1149 = dma.hbm_to_vmem [thread:$0]  (!%p1688_p11), %s2028_s5, 256, %s376_s21, [#allocation9], %s2027_s22, %s2027_s22, %s2026_s11  }
  0x5a   : > { %p1337_p8 = pneg %p1336_p4 }
  0x5c   : > { %p1344_p0 = pnand %p1343_p9, %p1337_p8 }
  0x5e   : > { %1347 = shalt.err (!%p1344_p0)
}
  0x5f   : > { %1152 = dma.hbm_to_vmem [thread:$0]  (!%p1688_p11), %s1979_s7, 256, %s392_s28, [#allocation12], %s2027_s22, %s2027_s22, %s2026_s11  }
  0x60   : > { %s418_s12 = scalar_lea.hbm %s1972_s0, %s1727_s16  ;;  %s412_s15 = scalar_lea.vmem [#allocation2], %s1724_s29 }
  0x61   : > { %s420_s17 = sshll.u32 %s412_s15, 4  ;;  %s2030_s26 = sand.u32 1, %s1540_s19   ;;  %s421_s17 = int_to_ptr.vmem [resolvable:$true] %s420_s17 }
  0x62   : > { %s409_s30 = scalar_lea.sflag [#allocation3], %s2030_s26  ;;  %s1361_s1 = scalar_lea.vmem %s421_s17, 64 }
  0x63   : > { %p1362_p7 = scmp.ne.s32.totalorder %s421_s17, %s1361_s1  ;;  %p2031_p10 = pneg %p1732_p2 }
  0x64   : > { %s1560_s21 = smov [#allocation2]  }
  0x65   : > { %p1364_p13 = pnand %p1362_p7, %p2031_p10  ;;  %s1366_s13 = sshll.u32 %s1560_s21, 4  ;;  %s1367_s13 = int_to_ptr.vmem [resolvable:$false] %s1366_s13 }
  0x66   : > { %s1368_s5 = scalar_lea.vmem %s1367_s13, 128  ;;  %p1369_p11 = scmp.lt.s32.totalorder %s421_s17, %s1367_s13 }
  0x67   : > { %p1365_p5 = pneg %p1364_p13  ;;  %p1370_p1 = scmp.lt.s32.totalorder %s1368_s5, %s1361_s1 }
  0x69   : > { %p1371_p6 = por %p1370_p1, %p1369_p11 }
  0x6b   : > { %p1372_p4 = pnand %p1371_p6, %p1365_p5 }
  0x6d   : > { %1375 = shalt.err (!%p1372_p4)
}
  0x6e   : > { %1156 = dma.hbm_to_vmem [thread:$0]  (!%p1732_p2), %s418_s12, 64, %s421_s17, %s409_s30  }
  0x6f   : > { %s456_s28 = scalar_lea.hbm %s1974_s2, %s1727_s16  ;;  %s450_s3 = scalar_lea.vmem [#allocation7], %s1724_s29 }
  0x70   : > { %s458_s8 = sshll.u32 %s450_s3, 4  ;;  %p2032_p12 = pmov %p2031_p10  ;;  %s459_s8 = int_to_ptr.vmem [resolvable:$true] %s458_s8 }
  0x71   : > { %s1389_s15 = scalar_lea.vmem %s459_s8, 64  ;;  %s1561_s1 = smov [#allocation7]  }
  0x72   : > { %p1390_p8 = scmp.ne.s32.totalorder %s459_s8, %s1389_s15  ;;  %s1394_s5 = sshll.u32 %s1561_s1, 4  ;;  %s1395_s5 = int_to_ptr.vmem [resolvable:$false] %s1394_s5 }
  0x73   : > { %s1396_s26 = scalar_lea.vmem %s1395_s5, 128  ;;  %p1397_p0 = scmp.lt.s32.totalorder %s459_s8, %s1395_s5 }
  0x74   : > { %p1392_p3 = pnand %p1390_p8, %p2032_p12  ;;  %p1398_p7 = scmp.lt.s32.totalorder %s1396_s26, %s1389_s15 }
  0x76   : > { %p1393_p9 = pneg %p1392_p3  ;;  %p1399_p10 = por %p1398_p7, %p1397_p0 }
  0x78   : > { %p1400_p13 = pnand %p1399_p10, %p1393_p9 }
  0x7a   : > { %1403 = shalt.err (!%p1400_p13)
}
  0x7b   : > { %1162 = dma.hbm_to_vmem [thread:$0]  (!%p1732_p2), %s456_s28, 64, %s459_s8, %s1742_s9  }
  0x7c   : > { %p2033_p5 = scmp.ne.s32.totalorder %s2016_s27, 0 }
  0x7d   : > { %s1800_s29 = sand.u32 (!%p2033_p5), 1, %s1536_s18   ;;  %p2034_p11 = scmp.ne.s32.totalorder (!%p2033_p5), %s2013_s25, 0 }
  0x7e   : > { %467 = sbr.rel (%p2033_p5) target bundleno = 408 (0x198), region = 56  ;;  %s1803_s16 = sshll.u32 (!%p2033_p5), %s1800_s29, 2 }
  0x7f   : > { %s470_s12 = scalar_lea.sflag (!%p2033_p5), [#allocation3], %s1800_s29  ;;  %s473_s17 = scalar_lea.vmem (!%p2033_p5), [#allocation2], %s1803_s16 }
  0x83   : > { %1507 = dma.done.wait (%p2034_p11), %s470_s12, 64  }
  0x84   : > { %1509 = vsyncadd (%p2034_p11), %s470_s12, 4294967232  ;;  %s478_s9 = sand.u32 1, %s1658_s23   ;;  %s482_s14 = scalar_lea.vmem [#allocation5], %s1803_s16 }
  0x85   : > { %s479_s27 = scalar_lea.sflag [#allocation6], %s478_s9 }
  0x86   : > { %1511 = dma.done.wait (%p2034_p11), %s479_s27, 128  }
  0x87   : > { %1513 = vsyncadd (%p2034_p11), %s479_s27, 4294967168  ;;  %s491_s30 = scalar_lea.vmem [#allocation7], %s1803_s16  ;;  %p2035_p2 = scmp.eq.s32.totalorder %s1658_s23, 0 }
  0x89   : > { %1515 = dma.done.wait (%p2035_p2), [#allocation9], 512   ;;  %p2036_p1 = pmov %p2035_p2 }
  0x8b   : > { %1517 = vsyncadd (%p2036_p1), [#allocation9], 4294966784  ;;  %p2037_p6 = pmov %p2036_p1 }
  0x8c   : > { %p2038_p4 = pmov %p2036_p1 }
  0x8d   : > { %1519 = dma.done.wait (%p2037_p6), [#allocation12], 256  }
  0x8e   : > { %1521 = vsyncadd (%p2038_p4), [#allocation12], 4294967040  ;;  %v1562_v0 = vmov 0.0   ;;  %vm1563_vm0 = vmmov 0   ;;  %v1236_v1 = vld [vmem:[#allocation8 + $0x8] sm:$0xff]   ;;  %v1237_v2 = vld [vmem:[#allocation10 + $0x8] sm:$0xff]  }
  0x8f   : > { %1095 = vmatprep.subr.bf16.mxu0 %v1562_v0  ;;  %1103 = vmatprep.subr.bf16.mxu1 %v1562_v0  ;;  %v1238_v3 = vld [vmem:[#allocation8] sm:$0xff]   ;;  %v1239_v4 = vld [vmem:[#allocation10] sm:$0xff]   ;;  %v563_v5 = vld [vmem:[%s473_s17] sm:$0xf]  ;;  %vm587_vm1 = vcmask 261120   ;;  %s1840_s22 = sshll.u32 %s1544_s20, 6 }
  0x90   : > { %1099 = vmatprep.mubr.msk.bf16.mxu0 %vm1563_vm0, %v1562_v0  ;;  %1107 = vmatprep.mubr.msk.bf16.mxu1 %vm1563_vm0, %v1562_v0  ;;  %v1240_v6 = vld [vmem:[#allocation11 + $0x8] sm:$0xff]   ;;  %v635_v7 = vld [vmem:[%s482_s14] sm:$0xf]  ;;  %v1241_v8 = vld [vmem:[#allocation11] sm:$0xff]   ;;  %s554_s28 = scalar_lea.vmem [#allocation14], %s1803_s16  ;;  %s547_s8 = scalar_lea.vmem [#allocation13], %s1803_s16 }
  0x91   : > { %1096 = vmatpush3.bf16.msra.mxu0 %v1236_v1  ;;  %1104 = vmatpush3.bf16.msra.mxu1 %v1237_v2  ;;  %v704_v9 = vld [vmem:[%s491_s30] sm:$0xf]  ;;  %v1066_v10 = vld [vmem:[%s1976_s4] ss:$0 sm:$0xff]  ;;  %s812_s3 = sshll.u32 %s554_s28, 4  ;;  %s798_s15 = sshll.u32 %s547_s8, 4  ;;  %s1852_s3 = int_to_ptr.vmem [resolvable:$true] %s812_s3  ;;  %s1860_s15 = int_to_ptr.vmem [resolvable:$true] %s798_s15 }
  0x92   : > { %1097 = vmatprep.subr.bf16.mxu0 %v1562_v0  ;;  %1105 = vmatprep.subr.bf16.mxu1 %v1562_v0  ;;  %v1070_v11 = vld [vmem:[%s1978_s6] ss:$0 sm:$0xff]  ;;  %s1850_s20 = scalar_lea.hbm %s1982_s10, %s1840_s22  ;;  %vm633_vm2 = vcmask 257024   ;;  %s2039_s17 = sld [smem:[#allocation33_spill]] }
  0x93   : > { %s2041_s21 = sld [smem:[#allocation32_spill]]  ;;  %s561_s13 = scalar_lea.vmem [#allocation16], %s1803_s16 }
  0x94   : > { %s1869_s11 = sshll.u32 %s561_s13, 4  ;;  %s1873_s1 = scalar_lea.sflag [#allocation15], %s478_s9  ;;  %s827_s11 = int_to_ptr.vmem [resolvable:$true] %s1869_s11 }
  0x95   : > { %1098 = vmatpush3.bf16.msra.mxu0 %v1238_v3  ;;  %1106 = vmatpush3.bf16.msra.mxu1 %v1239_v4  ;;  %s1404_s5 = scalar_lea.vmem %s1852_s3, 64  ;;  %p2042_p12 = scmp.ne.s32.totalorder %s2021_s24, 0 }
  0x96   : > { %1111 = vmatprep.subr.bf16.mxu0 %v1562_v0  ;;  %p1405_p8 = scmp.ne.s32.totalorder %s1852_s3, %s1404_s5  ;;  %s1564_s26 = smov [#allocation14]  }
  0x97   : > { %s1408_s12 = sshll.u32 %s1564_s26, 4  ;;  %s1409_s12 = int_to_ptr.vmem [resolvable:$false] %s1408_s12 }
  0x98   : > { %1100 = vmatmul.mubr.msk.bf16.vlgmr.msra.gmra.mxu0 %vm587_vm1, %v563_v5  ;;  %1108 = vmatmul.mubr.msk.bf16.vlgmr.msra.gmra.mxu1 %vm587_vm1, %v635_v7  ;;  %s2040_s27 = smov %s2039_s17  ;;  %s1858_s14 = scalar_lea.hbm %s2039_s17, %s1840_s22 }
  0x99   : > { %1112 = vmatpush3.bf16.msra.mxu0 %v1240_v6  ;;  %1115 = vmatprep.mubr.msk.bf16.mxu0 %vm1563_vm0, %v1562_v0  ;;  %v1074_v24 = vld [vmem:[%s2041_s21] ss:$0 sm:$0xff]  ;;  %p1406_p3 = pnand %p1405_p8, %p2042_p12  ;;  %s1410_s17 = scalar_lea.vmem %s1409_s12, 128 }
  0x9a   : > { %1113 = vmatprep.subr.bf16.mxu0 %v1562_v0  ;;  %p1411_p0 = scmp.lt.s32.totalorder %s1852_s3, %s1409_s12  ;;  %p1412_p7 = scmp.lt.s32.totalorder %s1410_s17, %s1404_s5 }
  0x9b   : > { %p1407_p9 = pneg %p1406_p3 }
  0x9c   : > { %p1413_p10 = por %p1412_p7, %p1411_p0 }
  0x9d   : > { %1114 = vmatpush3.bf16.msra.mxu0 %v1241_v8 }
  0x9e   : > { %p1414_p13 = pnand %p1413_p10, %p1407_p9 }
  0xa0   : > { %1116 = vmatmul.mubr.msk.bf16.vlgmr.msra.gmra.mxu0 %vm587_vm1, %v704_v9 }
 0x158   : > { %v625_v12 = vpop.f32.mrf.mxu0  ;;  %v696_v14 = vpop.f32.mrf.mxu1 }
 0x159   : > { %v626_v13 = vadd.f32 %v1066_v10, %v625_v12  ;;  %v697_v16 = vadd.f32 %v1070_v11, %v696_v14 }
 0x15a   : > { %v1101_v15 = vpop.f32.mrf.mxu0  ;;  %v1109_v18 = vpop.f32.mrf.mxu1 }
 0x15b   : > { %v631_v17 = vmul.f32 0.35355338, %v626_v13  ;;  %v702_v19 = vpack.c.bf16 %v697_v16, %v697_v16 }
 0x15c   : > { %v628_v20 = vpop.f32.mrf.mxu0  ;;  %v699_v22 = vpop.f32.mrf.mxu1 }
 0x15d   : > { %v632_v21 = vpack.c.bf16 %v631_v17, %v631_v17  ;;  %703 = vst.msk [vmem:[%s554_s28] sm:$0xf] %vm633_vm2, %v702_v19 }
 0x15e   : > { %v1102_v23 = vpop.f32.mrf.mxu0  ;;  %v1110_v25 = vpop.f32.mrf.mxu1 }
 0x15f   : > { %1417 = shalt.err (!%p1414_p13)
}
 0x160   : > { %s1418_s23 = scalar_lea.hbm %s1850_s20, 64  ;;  %s1422_s30 = scalar_lea.hbm %s1982_s10, 128 }
 0x161   : > { %p1419_p5 = scmp.ne.s32.totalorder %s1850_s20, %s1418_s23  ;;  %p1423_p1 = scmp.lt.s32.totalorder %s1850_s20, %s1982_s10 }
 0x162   : > { %p1424_p6 = scmp.lt.s32.totalorder %s1422_s30, %s1418_s23 }
 0x163   : > { %p1420_p11 = pnand %p1419_p5, %p2042_p12 }
 0x164   : > { %p1425_p4 = por %p1424_p6, %p1423_p1 }
 0x165   : > { %p1421_p2 = pneg %p1420_p11 }
 0x167   : > { %p1426_p8 = pnand %p1425_p4, %p1421_p2 }
 0x169   : > { %1429 = shalt.err (!%p1426_p8)
}
 0x16a   : > { %1138 = dma.vmem_to_hbm [thread:$0]  (%p2042_p12), %s1852_s3, 64, %s1850_s20, %s1873_s1   ;;  %634 = vst.msk [vmem:[%s547_s8] sm:$0xf] %vm633_vm2, %v632_v21  ;;  %v765_v26 = vpop.f32.mrf.mxu0 }
 0x16b   : > { %s774_s5 = scalar_lea.sflag [#allocation4], %s1800_s29  ;;  %s1430_s26 = scalar_lea.vmem %s1860_s15, 64 }
 0x16c   : > { %p1431_p3 = scmp.ne.s32.totalorder %s1860_s15, %s1430_s26  ;;  %s1565_s12 = smov [#allocation13]  }
 0x16d   : > { %s1434_s17 = sshll.u32 %s1565_s12, 4  ;;  %s1435_s17 = int_to_ptr.vmem [resolvable:$false] %s1434_s17 }
 0x16e   : > { %p1432_p9 = pnand %p1431_p3, %p2042_p12  ;;  %s1436_s23 = scalar_lea.vmem %s1435_s17, 128 }
 0x16f   : > { %p1437_p7 = scmp.lt.s32.totalorder %s1860_s15, %s1435_s17  ;;  %p1438_p10 = scmp.lt.s32.totalorder %s1436_s23, %s1430_s26 }
 0x170   : > { %p1433_p0 = pneg %p1432_p9 }
 0x171   : > { %p1439_p13 = por %p1438_p10, %p1437_p7 }
 0x173   : > { %p1440_p5 = pnand %p1439_p13, %p1433_p0 }
 0x175   : > { %1443 = shalt.err (!%p1440_p5)
}
 0x176   : > { %s1444_s3 = scalar_lea.hbm %s1858_s14, 64  ;;  %s1448_s20 = scalar_lea.hbm %s2040_s27, 128 }
 0x177   : > { %p1445_p11 = scmp.ne.s32.totalorder %s1858_s14, %s1444_s3  ;;  %p1449_p6 = scmp.lt.s32.totalorder %s1858_s14, %s2040_s27 }
 0x178   : > { %p1450_p4 = scmp.lt.s32.totalorder %s1448_s20, %s1444_s3 }
 0x179   : > { %p1446_p2 = pnand %p1445_p11, %p2042_p12 }
 0x17a   : > { %p1451_p8 = por %p1450_p4, %p1449_p6 }
 0x17b   : > { %p1447_p1 = pneg %p1446_p2 }
 0x17d   : > { %p1452_p3 = pnand %p1451_p8, %p1447_p1 }
 0x17f   : > { %1455 = shalt.err (!%p1452_p3)
}
 0x180   : > { %1137 = dma.vmem_to_hbm [thread:$0]  (%p2042_p12), %s1860_s15, 64, %s1858_s14, %s774_s5   ;;  %v766_v27 = vadd.f32 %v1074_v24, %v765_v26  ;;  %v1117_v28 = vpop.f32.mrf.mxu0 }
 0x181   : > { %s2043_s21 = sld [smem:[#allocation34_spill]]  ;;  %s1456_s17 = scalar_lea.vmem %s827_s11, 64 }
 0x182   : > { %v771_v29 = vpack.c.bf16 %v766_v27, %v766_v27  ;;  %v768_v30 = vpop.f32.mrf.mxu0  ;;  %p1457_p9 = scmp.ne.s32.totalorder %s827_s11, %s1456_s17  ;;  %s1566_s15 = smov [#allocation16]  }
 0x183   : > { %s1460_s14 = sshll.u32 %s1566_s15, 4  ;;  %s1461_s14 = int_to_ptr.vmem [resolvable:$false] %s1460_s14 }
 0x184   : > { %772 = vst.msk [vmem:[%s561_s13] sm:$0xf] %vm633_vm2, %v771_v29  ;;  %v1118_v31 = vpop.f32.mrf.mxu0  ;;  %p1458_p0 = pnand %p1457_p9, %p2042_p12  ;;  %s1462_s5 = scalar_lea.vmem %s1461_s14, 128 }
 0x185   : > { %p1463_p10 = scmp.lt.s32.totalorder %s827_s11, %s1461_s14  ;;  %p1464_p13 = scmp.lt.s32.totalorder %s1462_s5, %s1456_s17 }
 0x186   : > { %p1459_p7 = pneg %p1458_p0 }
 0x187   : > { %s2044_s26 = smov %s2043_s21  ;;  %s1924_s12 = scalar_lea.hbm %s2043_s21, %s1840_s22 }
 0x188   : > { %p1465_p5 = por %p1464_p13, %p1463_p10 }
 0x18a   : > { %p1466_p11 = pnand %p1465_p5, %p1459_p7 }
 0x18c   : > { %1469 = shalt.err (!%p1466_p11)
}
 0x18d   : > { %s1470_s16 = scalar_lea.hbm %s1924_s12, 64  ;;  %s1474_s23 = scalar_lea.hbm %s2044_s26, 128 }
 0x18e   : > { %p1471_p2 = scmp.ne.s32.totalorder %s1924_s12, %s1470_s16  ;;  %p1475_p4 = scmp.lt.s32.totalorder %s1924_s12, %s2044_s26 }
 0x18f   : > { %p1476_p8 = scmp.lt.s32.totalorder %s1474_s23, %s1470_s16 }
 0x190   : > { %p1472_p1 = pnand %p1471_p2, %p2042_p12 }
 0x191   : > { %p1477_p3 = por %p1476_p8, %p1475_p4 }
 0x192   : > { %p1473_p6 = pneg %p1472_p1 }
 0x194   : > { %p1478_p9 = pnand %p1477_p3, %p1473_p6 }
 0x196   : > { %1481 = shalt.err (!%p1478_p9)
}
 0x197   : > { %1139 = dma.vmem_to_hbm [thread:$0]  (%p2042_p12), %s827_s11, 64, %s1924_s12, %s1873_s1  }
 0x198 PF: > { %s2045_s8 = sld [smem:[#allocation23_spill]] }
 0x199   : > { %s2046_s20 = sld [smem:[#allocation26_spill]] }
 0x19a   : > { %s2047_s9 = sld [smem:[#allocation25_spill]] }
 0x19e   : > { %s838_s28 = sand.u32 1, %s2045_s8  }
 0x19f   : > { %p2048_p0 = scmp.ne.s32.totalorder %s2046_s20, 0  ;;  %s839_s30 = scalar_lea.sflag [#allocation4], %s838_s28 }
 0x1a0   : > { %p2049_p7 = scmp.ge.s32.totalorder %s2047_s9, 2 }
 0x1a2   : > { %p1164_p10 = pnand %p2049_p7, %p2048_p0 }
 0x1a4   : > { %p1165_p13 = pneg %p1164_p10 }
 0x1a6   : > { %1523 = dma.done.wait (%p1165_p13), %s839_s30, 64  }
 0x1a7   : > { %1525 = vsyncadd (%p1165_p13), %s839_s30, 4294967232  ;;  %s2050_s25 = sadd.s32 4294967294, %s2047_s9  }
 0x1a8   : > { %s847_s21 = sand.u32 1, %s2050_s25  }
 0x1a9   : > { %s848_s17 = scalar_lea.sflag [#allocation15], %s847_s21 }
 0x1aa   : > { %1527 = dma.done.wait (%p1165_p13), %s848_s17, 128  }
 0x1ab   : > { %1529 = vsyncadd (%p1165_p13), %s848_s17, 4294967168  ;;  %s36_s22 = sadd.s32 1, %s2047_s9   ;;  %s2051_s24 = sld [smem:[#allocation28_spill]] }
 0x1ac   : > { %p33_p12 = scmp.ge.s32.totalorder %s36_s22, 4   ;;  %s2052_s20 = sld [smem:[#allocation24_spill]] }
 0x1ad   : > { %s2053_s21 = sld [smem:[#allocation27_spill]]  ;;  %s2054_s17 = smov %s1536_s18 }
 0x1ae   : > { %s2055_s18 = smov %s1540_s19  ;;  %35 = sbr.rel (!%p33_p12) target bundleno = 19 (0x13), region = 169 }
 0x1b1   : > { %s2056_s19 = smov %s2051_s24 }
 0x1b3   :  { %862 = vsyncpa [#allocation3], 1 }
 0x1b4   :  { %864 = vsyncpa [#allocation3 + $0x1], 1 }
 0x1b5   :  { %865 = vsyncpa [#allocation6], 1 }
 0x1b6   :  { %867 = vsyncpa [#allocation6 + $0x1], 1 }
 0x1b7   :  { %868 = vsyncpa [#allocation9], 1 }
 0x1b8   :  { %869 = vsyncpa [#allocation12], 1 }
 0x1b9   :  { %870 = vsyncpa [#allocation4], 1 }
 0x1ba   :  { %872 = vsyncpa [#allocation4 + $0x1], 1 }
 0x1bb   :  { %873 = vsyncpa [#allocation15], 1 }
 0x1bc   :  { %875 = vsyncpa [#allocation15 + $0x1], 1 }

</bundles_post_ra>
